<compile_context>
chip_gen: v7x
topology: tpu7x:2x2x1
jax: 0.10.0
libtpu: 0.0.40
codegen_flags: <defaults>
</compile_context>

<pallas_src>
import functools

import jax
import jax.numpy as jnp
from jax.experimental import pallas as pl
from jax.experimental.pallas import tpu as pltpu

LSTM_IN = 24 * 6      # 144, fixed by the module
LSTM_H = 1024         # fixed by the module
IMG_OUT = 1000        # ImageClassifier output dim
SER_OUT = 1000        # SeriesClassifier output dim

_SUBLANE = 8
_LANE = 128


def _round_up(n, m):
    return ((n + m - 1) // m) * m


def _tile(dim, pref, align):
    """Largest tile <= pref that is a multiple of `align` and divides `dim`.
    `dim` is always pre-padded to a multiple of `align`, so this returns at
    least `align` (never silently falls back to the full, untiled dim)."""
    if dim <= pref:
        return dim
    t = (pref // align) * align
    while t > align and dim % t:
        t -= align
    return t


def _vmem_limit_bytes():
    cap = 64 * 1024 * 1024  # conservative default (v7x physical VMEM)
    try:
        cap = int(getattr(pltpu.get_tpu_info(), "vmem_capacity_bytes", cap)) or cap
    except Exception:
        pass
    # ~96 MiB on 128 MiB parts (v5e/v6e), ~48 MiB on v7x.
    return int(min(cap * 3 // 4, 96 * 1024 * 1024))


_VMEM_LIMIT = _vmem_limit_bytes()


# --------------------------------------------------------------------------
# Weight prep: cast to bf16 + pad once at init (perf feedback #1).
# --------------------------------------------------------------------------
def prep_linear(w, b, *, tk=1024):
    K, N = w.shape
    n_pad = _round_up(N, _LANE)
    k_pad = _round_up(K, tk) if K > tk else _round_up(K, _LANE)
    w = jnp.pad(w, ((0, k_pad - K), (0, n_pad - N))).astype(jnp.bfloat16)
    b = jnp.pad(b, (0, n_pad - N)).reshape(1, n_pad).astype(jnp.float32)
    return dict(w=w, b=b, n_out=N, k_in=K)


# --------------------------------------------------------------------------
# Kernel 1: tiled linear  o = x @ w + b
#   grid = (M/tm, N/tn, K/tk), f32 accumulator in VMEM, bf16 operands,
#   bias added once in the final K step; output written in out_dtype.
# --------------------------------------------------------------------------
def _linear_kernel(x_ref, w_ref, b_ref, o_ref, acc_ref):
    @pl.when(pl.program_id(2) == 0)
    def _():
        acc_ref[...] = jnp.zeros_like(acc_ref)

    acc_ref[...] += jnp.dot(x_ref[...], w_ref[...],
                            preferred_element_type=jnp.float32)

    @pl.when(pl.program_id(2) == pl.num_programs(2) - 1)
    def _():
        o_ref[...] = (acc_ref[...] + b_ref[...]).astype(o_ref.dtype)


def linear(x, p, *, tm=128, tn=1024, tk=1024, out_dtype=jnp.float32):
    w, b, n_out, k_in = p["w"], p["b"], p["n_out"], p["k_in"]
    M, K = x.shape
    assert K == k_in, (K, k_in)
    k_pad, n_pad = w.shape

    # Explicit zero padding (cdiv-style grid) instead of untiled fallbacks.
    if K != k_pad:
        x = jnp.pad(x, ((0, 0), (0, k_pad - K)))
    if M > tm:
        m_pad, tm_ = _round_up(M, tm), tm
    else:
        m_pad, tm_ = M, M          # block == full dim is always legal
    if m_pad != M:
        x = jnp.pad(x, ((0, m_pad - M), (0, 0)))
    xb = x.astype(jnp.bfloat16)

    tn_ = _tile(n_pad, tn, _LANE)
    tk_ = _tile(k_pad, tk, _LANE)
    grid = (m_pad // tm_, n_pad // tn_, k_pad // tk_)

    out = pl.pallas_call(
        _linear_kernel,
        out_shape=jax.ShapeDtypeStruct((m_pad, n_pad), out_dtype),
        grid_spec=pltpu.PrefetchScalarGridSpec(
            num_scalar_prefetch=0,
            grid=grid,
            in_specs=[
                pl.BlockSpec((tm_, tk_), lambda i, j, k: (i, k)),
                pl.BlockSpec((tk_, tn_), lambda i, j, k: (k, j)),
                pl.BlockSpec((1, tn_), lambda i, j, k: (0, j)),
            ],
            out_specs=pl.BlockSpec((tm_, tn_), lambda i, j, k: (i, j)),
            scratch_shapes=[pltpu.VMEM((tm_, tn_), jnp.float32)],
        ),
        compiler_params=pltpu.CompilerParams(
            dimension_semantics=("parallel", "parallel", "arbitrary"),
            vmem_limit_bytes=_VMEM_LIMIT,
        ),
    )(xb, w, b)
    return out[:M, :n_out]


# --------------------------------------------------------------------------
# Kernel 2: LSTM recurrence only (PyTorch gate order i, f, g, o).
#   gates_x: (T, Fp, 4H) bf16 -- precomputed x @ W_ih + (b_ih + b_hh)
#   w_hh   : (H, 4H) bf16, resident across the whole grid
#   h_out  : (T, Fp, H) bf16, one (1, Fp, H) block written per step
# h (bf16) / c (f32) are carried across grid steps in VMEM scratch.
# The SeriesClassifier FC is deferred to a tiled `linear` outside (un-fused).
# --------------------------------------------------------------------------
def _lstm_kernel(gx_ref, w_hh_ref, h_out_ref, h_scr, c_scr, *, hidden):
    t = pl.program_id(0)
    H = hidden

    @pl.when(t == 0)
    def _():
        h_scr[...] = jnp.zeros_like(h_scr)
        c_scr[...] = jnp.zeros_like(c_scr)

    gates = gx_ref[0].astype(jnp.float32) + jnp.dot(
        h_scr[...], w_hh_ref[...], preferred_element_type=jnp.float32)  # (Fp, 4H)
    i_g = jax.nn.sigmoid(gates[:, 0:H])
    f_g = jax.nn.sigmoid(gates[:, H:2 * H])
    g_g = jnp.tanh(gates[:, 2 * H:3 * H])
    o_g = jax.nn.sigmoid(gates[:, 3 * H:4 * H])

    c_new = f_g * c_scr[...] + i_g * g_g
    h_new = (o_g * jnp.tanh(c_new)).astype(jnp.bfloat16)
    c_scr[...] = c_new
    h_scr[...] = h_new
    h_out_ref[0] = h_new


def lstm_hidden_seq(gates_x, w_hh_b):
    T, Fp, G = gates_x.shape
    H = w_hh_b.shape[0]
    assert G == 4 * H and Fp % _SUBLANE == 0

    kernel = functools.partial(_lstm_kernel, hidden=H)
    return pl.pallas_call(
        kernel,
        out_shape=jax.ShapeDtypeStruct((T, Fp, H), jnp.bfloat16),
        grid_spec=pltpu.PrefetchScalarGridSpec(
            num_scalar_prefetch=0,
            grid=(T,),
            in_specs=[
                pl.BlockSpec((1, Fp, G), lambda t: (t, 0, 0)),
                pl.BlockSpec((H, G), lambda t: (0, 0)),   # resident W_hh (bf16)
            ],
            out_specs=pl.BlockSpec((1, Fp, H), lambda t: (t, 0, 0)),
            scratch_shapes=[pltpu.VMEM((Fp, H), jnp.bfloat16),   # h carry
                            pltpu.VMEM((Fp, H), jnp.float32)],   # c carry
        ),
        compiler_params=pltpu.CompilerParams(
            dimension_semantics=("arbitrary",),  # sequential recurrence
            vmem_limit_bytes=_VMEM_LIMIT,
        ),
    )(gates_x, w_hh_b)


# --------------------------------------------------------------------------
# Kernel 3: fusion head: concat([out1, out2], 1) -> dropout -> fc
# Whole-array kernel (everything tiny); bf16 matmul, f32 accumulation.
# Eval mode passes no mask at all; train mode applies the mask in-kernel.
# --------------------------------------------------------------------------
def _fusion_eval_kernel(x_ref, w_ref, b_ref, o_ref):
    o_ref[...] = (jnp.dot(x_ref[...], w_ref[...],
                          preferred_element_type=jnp.float32) + b_ref[...])


def _fusion_train_kernel(x_ref, m_ref, w_ref, b_ref, o_ref):
    x = x_ref[...] * m_ref[...]
    o_ref[...] = (jnp.dot(x, w_ref[...],
                          preferred_element_type=jnp.float32) + b_ref[...])


def fusion_fc(x_cat, p, mask=None):
    w, b, n_out = p["w"], p["b"], p["n_out"]
    B, D = x_cat.shape
    k_pad, n_pad = w.shape
    if D != k_pad:
        x_cat = jnp.pad(x_cat, ((0, 0), (0, k_pad - D)))
    xb = x_cat.astype(jnp.bfloat16)

    if mask is None:
        kernel, args = _fusion_eval_kernel, (xb, w, b)
    else:
        if mask.shape[1] != k_pad:
            mask = jnp.pad(mask, ((0, 0), (0, k_pad - mask.shape[1])))
        kernel, args = _fusion_train_kernel, (xb, mask.astype(jnp.bfloat16), w, b)

    out = pl.pallas_call(
        kernel,
        out_shape=jax.ShapeDtypeStruct((B, n_pad), jnp.float32),
        in_specs=[pl.BlockSpec(memory_space=pltpu.MemorySpace.VMEM)] * len(args),
        out_specs=pl.BlockSpec(memory_space=pltpu.MemorySpace.VMEM),
        compiler_params=pltpu.CompilerParams(vmem_limit_bytes=_VMEM_LIMIT),
    )(*args)
    return out[:, :n_out]


# --------------------------------------------------------------------------
# Model: parameter construction + forward pass (glue in plain JAX)
# --------------------------------------------------------------------------
def init_params(key, img_flat_dim, num_features, num_classes):
    ks = jax.random.split(key, 8)
    s = 0.02
    w_img = s * jax.random.normal(ks[0], (img_flat_dim, IMG_OUT), jnp.float32)
    b_img = s * jax.random.normal(ks[1], (IMG_OUT,), jnp.float32)
    w_ih = s * jax.random.normal(ks[2], (LSTM_IN, 4 * LSTM_H), jnp.float32)
    w_hh = s * jax.random.normal(ks[3], (LSTM_H, 4 * LSTM_H), jnp.float32)
    b_lstm = s * jax.random.normal(ks[4], (4 * LSTM_H,), jnp.float32)  # b_ih + b_hh
    w_s = s * jax.random.normal(ks[5], (num_features * LSTM_H, SER_OUT), jnp.float32)
    b_s = s * jax.random.normal(ks[6], (SER_OUT,), jnp.float32)
    w_f = s * jax.random.normal(ks[7], (IMG_OUT + SER_OUT, num_classes), jnp.float32)
    b_f = jnp.zeros((num_classes,), jnp.float32)
    # Weights are cast to bf16 and lane/tile padded ONCE here.
    return dict(
        img=prep_linear(w_img, b_img),          # image-path stand-in (see TODO)
        ih=prep_linear(w_ih, b_lstm),           # LSTM input projection
        w_hh=w_hh.astype(jnp.bfloat16),         # LSTM recurrent weight (resident)
        ser=prep_linear(w_s, b_s),              # SeriesClassifier fc
        fus=prep_linear(w_f, b_f),              # Fusion fc
    )


def feature_fusion_forward(images, series, params, *, drop_rate=0.1,
                           training=False, seed=0):
    B = images.shape[0]
    T, F, d_in = series.shape
    assert d_in == LSTM_IN
    # torch quirk: nn.LSTM (batch_first=False) uses dim0 of `series` as the
    # sequence axis; the final cat() only works if that equals the image batch.
    assert T == B, f"series seq len ({T}) must equal image batch ({B})"

    # --- image path (stand-in for ResNet-101): flatten NCHW -> tiled linear.
    # Independent of the serialized LSTM below (no artificial dependency; on
    # v7x the compiler may overlap it with the recurrence).
    out1 = linear(images.reshape(B, -1), params["img"])                 # (B, 1000)

    # --- series path: input projection hoisted out of the recurrence (one big
    # tiled matmul, bf16 output), F padded to 8 sublanes for full vreg tiles.
    fp = _round_up(F, _SUBLANE)
    series_p = jnp.pad(series, ((0, 0), (0, fp - F), (0, 0)))
    gates_x = linear(series_p.reshape(T * fp, LSTM_IN), params["ih"],
                     out_dtype=jnp.bfloat16).reshape(T, fp, 4 * LSTM_H)

    # recurrence only (h_t written out in bf16), then the un-fused series FC as
    # a full-rows tiled matmul: (T, F*H) @ (F*H, 1000).
    h_seq = lstm_hidden_seq(gates_x, params["w_hh"])                    # (T, fp, H)
    out2 = linear(h_seq[:, :F, :].reshape(T, F * LSTM_H), params["ser"])  # (T, 1000)

    # --- fusion: cat([out1, out2], dim=1) -> dropout -> fc
    x_cat = jnp.concatenate([out1, out2], axis=1)                       # (B, 2000)
    mask = None
    if training and drop_rate > 0.0:
        # TODO(synk): dropout mask drawn host-side with jax.random (stateful
        # pltpu.prng_* has no interpret/CPU lowering); mask is applied inside
        # the fusion kernel. Eval mode is the identity, matching nn.Dropout.
        keep = 1.0 - drop_rate
        if keep <= 0.0:
            mask = jnp.zeros_like(x_cat)
        else:
            mask = (jax.random.bernoulli(jax.random.PRNGKey(seed), keep,
                                         x_cat.shape).astype(jnp.float32) / keep)
    return fusion_fc(x_cat, params["fus"], mask)


if __name__ == "__main__":
    B, C, H, W = 2, 3, 16, 16          # small NCHW images
    NUM_FEATURES = 4                   # series "num_features"
    NUM_CLASSES = 10
    DROP_RATE = 0.1

    key = jax.random.PRNGKey(0)
    k_img, k_ser, k_par = jax.random.split(key, 3)

    images = jax.random.normal(k_img, (B, C, H, W), jnp.float32)
    series = jax.random.normal(k_ser, (B, NUM_FEATURES, LSTM_IN), jnp.float32)

    params = init_params(k_par, C * H * W, NUM_FEATURES, NUM_CLASSES)

    out = feature_fusion_forward(images, series, params,
                                 drop_rate=DROP_RATE, training=False, seed=0)
    out = jax.block_until_ready(out)

    assert out.shape == (B, NUM_CLASSES), out.shape
    assert bool(jnp.all(jnp.isfinite(out)))
    print("KERNEL_OK")
</pallas_src>

<mosaic_0001>
module attributes {stable_mosaic.version = 11 : i64} {
  func.func @_linear_kernel(%arg0: i32, %arg1: i32, %arg2: i32, %arg3: memref<2x768xbf16, #tpu.memory_space<vmem>>, %arg4: memref<768x1024xbf16, #tpu.memory_space<vmem>>, %arg5: memref<1x1024xf32, #tpu.memory_space<vmem>>, %arg6: memref<2x1024xf32, #tpu.memory_space<vmem>>, %arg7: memref<2x1024xf32, #tpu.memory_space<vmem>>) attributes {dimension_semantics = [#tpu.dimension_semantics<parallel>, #tpu.dimension_semantics<parallel>, #tpu.dimension_semantics<arbitrary>], iteration_bounds = array<i64: 1, 1, 1>, scalar_prefetch = 0 : i64, scratch_operands = 1 : i64, tpu.core_type = #tpu.core_type<tc>, window_params = [{transform_indices = @transform_0, window_bounds = array<i64: 2, 768>}, {transform_indices = @transform_1, window_bounds = array<i64: 768, 1024>}, {transform_indices = @transform_2, window_bounds = array<i64: 1, 1024>}, {transform_indices = @transform_3, window_bounds = array<i64: 2, 1024>}]} {
    %c0_i32 = arith.constant 0 : i32
    %0 = arith.cmpi eq, %arg2, %c0_i32 : i32
    %1 = arith.extui %0 : i1 to i32
    %c0_i32_0 = arith.constant 0 : i32
    %2 = arith.cmpi ne, %1, %c0_i32_0 : i32
    scf.if %2 {
      %cst_10 = arith.constant 0.000000e+00 : f32
      %12 = vector.broadcast %cst_10 : f32 to vector<2x1024xf32>
      %c0_11 = arith.constant 0 : index
      %c0_12 = arith.constant 0 : index
      %13 = vector.load %arg7[%c0_11, %c0_12] : memref<2x1024xf32, #tpu.memory_space<vmem>>, vector<2x1024xf32>
      tpu.vector_store %arg7[%c0_11, %c0_12], %12 {strides = array<i32>} : memref<2x1024xf32, #tpu.memory_space<vmem>>, vector<2x1024xf32>,
    } else {
    }
    %c0 = arith.constant 0 : index
    %c0_1 = arith.constant 0 : index
    %3 = vector.load %arg7[%c0, %c0_1] : memref<2x1024xf32, #tpu.memory_space<vmem>>, vector<2x1024xf32>
    %c0_2 = arith.constant 0 : index
    %c0_3 = arith.constant 0 : index
    %4 = vector.load %arg3[%c0_2, %c0_3] : memref<2x768xbf16, #tpu.memory_space<vmem>>, vector<2x768xbf16>
    %c0_4 = arith.constant 0 : index
    %c0_5 = arith.constant 0 : index
    %5 = vector.load %arg4[%c0_4, %c0_5] : memref<768x1024xbf16, #tpu.memory_space<vmem>>, vector<768x1024xbf16>
    %cst = arith.constant dense<0.000000e+00> : vector<2x1024xf32>
    %6 = tpu.matmul %4, %5, %cst {dimension_numbers = #tpu.dot_dimension_numbers<[1], [0], [0], [1], [0, 0, 1, 1], [], []>} : vector<2x768xbf16>, vector<768x1024xbf16>, vector<2x1024xf32> -> vector<2x1024xf32>
    %7 = arith.addf %3, %6 : vector<2x1024xf32>
    %c0_6 = arith.constant 0 : index
    %c0_7 = arith.constant 0 : index
    %8 = vector.load %arg7[%c0_6, %c0_7] : memref<2x1024xf32, #tpu.memory_space<vmem>>, vector<2x1024xf32>
    tpu.vector_store %arg7[%c0_6, %c0_7], %7 {strides = array<i32>} : memref<2x1024xf32, #tpu.memory_space<vmem>>, vector<2x1024xf32>,
    %c0_i32_8 = arith.constant 0 : i32
    %9 = arith.cmpi eq, %arg2, %c0_i32_8 : i32
    %10 = arith.extui %9 : i1 to i32
    %c0_i32_9 = arith.constant 0 : i32
    %11 = arith.cmpi ne, %10, %c0_i32_9 : i32
    scf.if %11 {
      %c0_10 = arith.constant 0 : index
      %c0_11 = arith.constant 0 : index
      %12 = vector.load %arg7[%c0_10, %c0_11] : memref<2x1024xf32, #tpu.memory_space<vmem>>, vector<2x1024xf32>
      %c0_12 = arith.constant 0 : index
      %c0_13 = arith.constant 0 : index
      %13 = vector.load %arg5[%c0_12, %c0_13] : memref<1x1024xf32, #tpu.memory_space<vmem>>, vector<1x1024xf32>
      %14 = vector.broadcast %13 : vector<1x1024xf32> to vector<2x1024xf32>
      %15 = arith.addf %12, %14 : vector<2x1024xf32>
      %c0_14 = arith.constant 0 : index
      %c0_15 = arith.constant 0 : index
      %16 = vector.load %arg6[%c0_14, %c0_15] : memref<2x1024xf32, #tpu.memory_space<vmem>>, vector<2x1024xf32>
      tpu.vector_store %arg6[%c0_14, %c0_15], %15 {strides = array<i32>} : memref<2x1024xf32, #tpu.memory_space<vmem>>, vector<2x1024xf32>,
    } else {
    }
    return
  }
  func.func @transform_0(%arg0: i32, %arg1: i32, %arg2: i32) -> (i32, i32) {
    %c0_i32 = arith.constant 0 : i32
    return %arg0, %arg2 : i32, i32
  }
  func.func @transform_1(%arg0: i32, %arg1: i32, %arg2: i32) -> (i32, i32) {
    %c0_i32 = arith.constant 0 : i32
    return %arg2, %arg1 : i32, i32
  }
  func.func @transform_2(%arg0: i32, %arg1: i32, %arg2: i32) -> (i32, i32) {
    %c0_i32 = arith.constant 0 : i32
    %c0_i32_0 = arith.constant 0 : i32
    return %c0_i32, %arg1 : i32, i32
  }
  func.func @transform_3(%arg0: i32, %arg1: i32, %arg2: i32) -> (i32, i32) {
    %c0_i32 = arith.constant 0 : i32
    return %arg0, %arg1 : i32, i32
  }
}

</mosaic_0001>

<bundles_post_ra>
// kernel: tpu_custom_call.1
= control target key start
LH: loop header
LB: loop body
LE: loop exit
PB: predicated region body
PF: predicated region fallthrough
CT: control target
= control target key end

     0   :  { %8 = vsyncpa [#allocation4], 0  ;;  %s3719_s0 = inlined_call_operand.hbm [shape: bf16[2,768], index: 0, kind: input, shape index: {}]   ;;  %s3720_s1 = inlined_call_operand.hbm [shape: bf16[768,1024], index: 1, kind: input, shape index: {}]   ;;  %s3721_s2 = inlined_call_operand.hbm [shape: f32[1,1024], index: 2, kind: input, shape index: {}]   ;;  %s3722_s3 = inlined_call_operand.hbm [shape: f32[2,1024], index: 3, kind: output, shape index: {}]  }
   0x1   :  { %9 = vsyncpa [#allocation7], 0 }
   0x2   :  { %10 = vsyncpa [#allocation5], 0  ;;  %s3573_s12 = smov [#allocation6]   ;;  %s3479_s16 = scalar_lea.hbm %s3720_s1, 49152 }
   0x3   :  { %s26_s13 = sshll.u32 %s3573_s12, 4  ;;  %p3480_p0 = scmp.ne.s32.totalorder %s3720_s1, %s3479_s16  ;;  %s27_s13 = int_to_ptr.vmem [resolvable:$true] %s26_s13 }
   0x4   :  { %p3483_p1 = scmp.lt.u32.totalorder %s3479_s16, %s3720_s1 }
   0x6   :  { %p3485_p2 = pnand %p3483_p1, %p3480_p0 }
   0x8   :  { %3488 = shalt.err (!%p3485_p2)
}
   0x9   :  { %s3489_s21 = scalar_lea.vmem %s27_s13, 49152  ;;  %p3494_p4 = scmp.lt.s32.totalorder %s27_s13, %s27_s13 }
   0xa   :  { %p3490_p3 = scmp.ne.s32.totalorder %s27_s13, %s3489_s21  ;;  %p3495_p5 = scmp.lt.s32.totalorder %s3489_s21, %s3489_s21 }
   0xc   :  { %p3496_p6 = por %p3495_p5, %p3494_p4 }
   0xe   :  { %p3497_p7 = pnand %p3496_p6, %p3490_p3 }
  0x10   :  { %3500 = shalt.err (!%p3497_p7)
}
  0x11   :  { %s3574_s22 = smov 512   ;;  %s3575_s23 = smov 32  }
  0x12   :  { %32 = dma.hbm_to_vmem [thread:$0]  %s3720_s1, 49152, %s27_s13, [#allocation7], %s3574_s22, %s3574_s22, %s3575_s23  }
  0x13   :  { %s3576_s26 = smov [#allocation3]   ;;  %s3577_s28 = smov [#allocation8]  }
  0x14   :  { %s17_s27 = sshll.u32 %s3576_s26, 4  ;;  %s39_s29 = sshll.u32 %s3577_s28, 4  ;;  %s18_s27 = int_to_ptr.vmem [resolvable:$true] %s17_s27  ;;  %s40_s29 = int_to_ptr.vmem [resolvable:$true] %s39_s29 }
  0x15   :  { %s3501_s5 = scalar_lea.hbm %s3719_s0, 96 }
  0x16   :  { %p3502_p8 = scmp.ne.s32.totalorder %s3719_s0, %s3501_s5  ;;  %p3505_p9 = scmp.lt.u32.totalorder %s3501_s5, %s3719_s0 }
  0x18   :  { %p3507_p10 = pnand %p3505_p9, %p3502_p8 }
  0x1a   :  { %3510 = shalt.err (!%p3507_p10)
}
  0x1b   :  { %s3511_s1 = scalar_lea.vmem %s18_s27, 96  ;;  %p3516_p12 = scmp.lt.s32.totalorder %s18_s27, %s18_s27 }
  0x1c   :  { %p3512_p11 = scmp.ne.s32.totalorder %s18_s27, %s3511_s1  ;;  %p3517_p13 = scmp.lt.s32.totalorder %s3511_s1, %s3511_s1 }
  0x1e   :  { %p3518_p0 = por %p3517_p13, %p3516_p12 }
  0x20   :  { %p3519_p1 = pnand %p3518_p0, %p3512_p11 }
  0x22   :  { %3522 = shalt.err (!%p3519_p1)
}
  0x23   :  { %20 = dma.hbm_to_vmem [thread:$0]  %s3719_s0, 96, %s18_s27, [#allocation4]  }
  0x24   :  { %s3523_s14 = scalar_lea.hbm %s3721_s2, 128 }
  0x25   :  { %p3524_p2 = scmp.ne.s32.totalorder %s3721_s2, %s3523_s14  ;;  %p3527_p3 = scmp.lt.u32.totalorder %s3523_s14, %s3721_s2 }
  0x27   :  { %p3529_p4 = pnand %p3527_p3, %p3524_p2 }
  0x29   :  { %3532 = shalt.err (!%p3529_p4)
}
  0x2a   :  { %s3533_s19 = scalar_lea.vmem %s40_s29, 128  ;;  %p3538_p6 = scmp.lt.s32.totalorder %s40_s29, %s40_s29 }
  0x2b   :  { %p3534_p5 = scmp.ne.s32.totalorder %s40_s29, %s3533_s19  ;;  %p3539_p7 = scmp.lt.s32.totalorder %s3533_s19, %s3533_s19 }
  0x2d   :  { %p3540_p8 = por %p3539_p7, %p3538_p6 }
  0x2f   :  { %p3541_p9 = pnand %p3540_p8, %p3534_p5 }
  0x31   :  { %3544 = shalt.err (!%p3541_p9)
}
  0x32   :  { %42 = dma.hbm_to_vmem [thread:$0]  %s3721_s2, 128, %s40_s29, [#allocation7]  }
  0x33   :  { %3567 = dma.done.wait [#allocation4], 96  }
  0x34   :  { %3568 = vsyncadd [#allocation4], 4294967200 }
  0x35   :  { %3569 = dma.done.wait [#allocation7], 49280  }
  0x36   :  { %3570 = vsyncadd [#allocation7], 4294918016  ;;  %v61_v0 = vld [vmem:[#allocation6] sm:$0xff]  ;;  %v62_v2 = vld [vmem:[#allocation6 + $0x8] sm:$0xff]  ;;  %v3578_v32 = vmov 1966171168   ;;  %v450_v34 = vlaneseq }
  0x37   :  { %v65_v1 = vld [vmem:[#allocation6 + $0x20] sm:$0xff]  ;;  %v66_v4 = vld [vmem:[#allocation6 + $0x28] sm:$0xff]  ;;  %v448_v33 = vunpack.c.l.s4 %v3578_v32  ;;  %v3642_v59 = vld [vmem:[#allocation3] sm:$0x3f]  ;;  %s3580_s2 = smov [#allocation9]  }
  0x38   :  { %v3055_v3 = vcombine.high %v61_v0, %v65_v1  ;;  %v3054_v5 = vcombine.low %v61_v0, %v65_v1  ;;  %v69_v6 = vld [vmem:[#allocation6 + $0x40] sm:$0xff]  ;;  %v3057_v8 = vcombine.high %v62_v2, %v66_v4  ;;  %v3056_v9 = vcombine.low %v62_v2, %v66_v4  ;;  %v70_v11 = vld [vmem:[#allocation6 + $0x48] sm:$0xff]  ;;  %s3044_s21 = sshll.u32 %s3580_s2, 4  ;;  %s3045_s21 = int_to_ptr.vmem [resolvable:$true] %s3044_s21 }
  0x39   :  { %v73_v7 = vld [vmem:[#allocation6 + $0x60] sm:$0xff]  ;;  %v74_v12 = vld [vmem:[#allocation6 + $0x68] sm:$0xff]  ;;  %v449_v43 = vunpack.c.0.s8 %v448_v33  ;;  %v3637_v44 = vshrl.u32 %v450_v34, 7  ;;  %s3545_s22 = scalar_lea.vmem %s3045_s21, 256  ;;  %p3550_p11 = scmp.lt.s32.totalorder %s3045_s21, %s3045_s21 }
  0x3a   :  { %v3063_v10 = vcombine.high %v69_v6, %v73_v7  ;;  %v77_v13 = vld [vmem:[#allocation6 + $0x80] sm:$0xff]  ;;  %2419 = vmatprep.subr.bf16.mxu0 %v3055_v3  ;;  %v3065_v14 = vcombine.high %v70_v11, %v74_v12  ;;  %v78_v16 = vld [vmem:[#allocation6 + $0x88] sm:$0xff]  ;;  %2542 = vmatprep.subr.bf16.mxu1 %v3057_v8  ;;  %v3062_v18 = vcombine.low %v69_v6, %v73_v7  ;;  %p3546_p10 = scmp.ne.s32.totalorder %s3045_s21, %s3545_s22  ;;  %p3551_p12 = scmp.lt.s32.totalorder %s3545_s22, %s3545_s22 }
  0x3b   :  { %v81_v15 = vld [vmem:[#allocation6 + $0xa0] sm:$0xff]  ;;  %v82_v17 = vld [vmem:[#allocation6 + $0xa8] sm:$0xff]  ;;  %2420 = vmatpush1.bf16.msra.mxu0 %v3054_v5  ;;  %2543 = vmatpush1.bf16.msra.mxu1 %v3056_v9  ;;  %v3064_v19 = vcombine.low %v70_v11, %v74_v12  ;;  %v3640_v53 = vsub.s32 %v449_v43, %v3637_v44 }
  0x3c   :  { %2421 = vmatprep.subr.bf16.mxu0 %v3063_v10  ;;  %v3071_v20 = vcombine.high %v77_v13, %v81_v15  ;;  %2544 = vmatprep.subr.bf16.mxu1 %v3065_v14  ;;  %v3073_v21 = vcombine.high %v78_v16, %v82_v17  ;;  %v85_v22 = vld [vmem:[#allocation6 + $0xc0] sm:$0xff]  ;;  %v86_v24 = vld [vmem:[#allocation6 + $0xc8] sm:$0xff]  ;;  %v3070_v26 = vcombine.low %v77_v13, %v81_v15  ;;  %p3552_p13 = por %p3551_p12, %p3550_p11 }
  0x3d   :  { %v89_v23 = vld [vmem:[#allocation6 + $0xe0] sm:$0xff]  ;;  %v90_v25 = vld [vmem:[#allocation6 + $0xe8] sm:$0xff]  ;;  %v3072_v27 = vcombine.low %v78_v16, %v82_v17  ;;  %v3646_v63 = vrot.slane %v3642_v59, %v3640_v53 }
  0x3e   :  { %v3079_v28 = vcombine.high %v85_v22, %v89_v23  ;;  %v3081_v29 = vcombine.high %v86_v24, %v90_v25  ;;  %v93_v30 = vld [vmem:[#allocation6 + $0x100] sm:$0xff]  ;;  %v94_v35 = vld [vmem:[#allocation6 + $0x108] sm:$0xff]  ;;  %v3078_v37 = vcombine.low %v85_v22, %v89_v23  ;;  %v3080_v38 = vcombine.low %v86_v24, %v90_v25  ;;  %p3553_p0 = pnand %p3552_p13, %p3546_p10 }
  0x3f   :  { %2422 = vmatpush1.bf16.msra.mxu0 %v3062_v18  ;;  %2545 = vmatpush1.bf16.msra.mxu1 %v3064_v19  ;;  %v97_v31 = vld [vmem:[#allocation6 + $0x120] sm:$0xff]  ;;  %v98_v36 = vld [vmem:[#allocation6 + $0x128] sm:$0xff]  ;;  %v461_v3 = vcombine.high %v3646_v63, %v3646_v63 }
  0x40   :  { %2423 = vmatprep.subr.bf16.mxu0 %v3071_v20  ;;  %2546 = vmatprep.subr.bf16.mxu1 %v3073_v21  ;;  %v3087_v39 = vcombine.high %v93_v30, %v97_v31  ;;  %v3089_v40 = vcombine.high %v94_v35, %v98_v36  ;;  %v101_v41 = vld [vmem:[#allocation6 + $0x140] sm:$0xff]  ;;  %v102_v45 = vld [vmem:[#allocation6 + $0x148] sm:$0xff]  ;;  %v3086_v47 = vcombine.low %v93_v30, %v97_v31 }
  0x41   :  { %v105_v42 = vld [vmem:[#allocation6 + $0x160] sm:$0xff]  ;;  %v106_v46 = vld [vmem:[#allocation6 + $0x168] sm:$0xff]  ;;  %v3088_v48 = vcombine.low %v94_v35, %v98_v36  ;;  %v3651_v9 = vrot.slane %v461_v3, %v3640_v53 }
  0x42   :  { %v3095_v49 = vcombine.high %v101_v41, %v105_v42  ;;  %v3097_v50 = vcombine.high %v102_v45, %v106_v46  ;;  %v109_v51 = vld [vmem:[#allocation6 + $0x180] sm:$0xff]  ;;  %v110_v54 = vld [vmem:[#allocation6 + $0x188] sm:$0xff]  ;;  %v3094_v56 = vcombine.low %v101_v41, %v105_v42  ;;  %v3096_v57 = vcombine.low %v102_v45, %v106_v46 }
  0x43   :  { %2424 = vmatpush1.bf16.msra.mxu0 %v3070_v26  ;;  %2547 = vmatpush1.bf16.msra.mxu1 %v3072_v27  ;;  %v113_v52 = vld [vmem:[#allocation6 + $0x1a0] sm:$0xff]  ;;  %v114_v55 = vld [vmem:[#allocation6 + $0x1a8] sm:$0xff] }
  0x44   :  { %2425 = vmatprep.subr.bf16.mxu0 %v3079_v28  ;;  %2548 = vmatprep.subr.bf16.mxu1 %v3081_v29  ;;  %v3103_v58 = vcombine.high %v109_v51, %v113_v52  ;;  %v3105_v60 = vcombine.high %v110_v54, %v114_v55  ;;  %v117_v61 = vld [vmem:[#allocation6 + $0x1c0] sm:$0xff]  ;;  %v118_v0 = vld [vmem:[#allocation6 + $0x1c8] sm:$0xff]  ;;  %v3102_v2 = vcombine.low %v109_v51, %v113_v52 }
  0x45   :  { %v121_v62 = vld [vmem:[#allocation6 + $0x1e0] sm:$0xff]  ;;  %v122_v1 = vld [vmem:[#allocation6 + $0x1e8] sm:$0xff]  ;;  %v3104_v4 = vcombine.low %v110_v54, %v114_v55  ;;  %2451 = vmatprep.mubr.bf16.mxu0 %v3651_v9  ;;  %2574 = vmatprep.mubr.bf16.mxu1 %v3651_v9 }
  0x46   :  { %v3111_v5 = vcombine.high %v117_v61, %v121_v62  ;;  %v3113_v6 = vcombine.high %v118_v0, %v122_v1  ;;  %v125_v7 = vld [vmem:[#allocation6 + $0x200] sm:$0xff]  ;;  %v126_v10 = vld [vmem:[#allocation6 + $0x208] sm:$0xff]  ;;  %v3110_v12 = vcombine.low %v117_v61, %v121_v62  ;;  %v3112_v13 = vcombine.low %v118_v0, %v122_v1 }
  0x47   :  { %2426 = vmatpush1.bf16.msra.mxu0 %v3078_v37  ;;  %2549 = vmatpush1.bf16.msra.mxu1 %v3080_v38  ;;  %v129_v8 = vld [vmem:[#allocation6 + $0x220] sm:$0xff]  ;;  %v130_v11 = vld [vmem:[#allocation6 + $0x228] sm:$0xff] }
  0x48   :  { %2427 = vmatprep.subr.bf16.mxu0 %v3087_v39  ;;  %2550 = vmatprep.subr.bf16.mxu1 %v3089_v40  ;;  %v3119_v14 = vcombine.high %v125_v7, %v129_v8  ;;  %v3121_v15 = vcombine.high %v126_v10, %v130_v11  ;;  %v133_v16 = vld [vmem:[#allocation6 + $0x240] sm:$0xff]  ;;  %v134_v18 = vld [vmem:[#allocation6 + $0x248] sm:$0xff]  ;;  %v3118_v20 = vcombine.low %v125_v7, %v129_v8 }
  0x49   :  { %v137_v17 = vld [vmem:[#allocation6 + $0x260] sm:$0xff]  ;;  %v138_v19 = vld [vmem:[#allocation6 + $0x268] sm:$0xff]  ;;  %v3120_v21 = vcombine.low %v126_v10, %v130_v11 }
  0x4a   :  { %v3127_v22 = vcombine.high %v133_v16, %v137_v17  ;;  %v3129_v23 = vcombine.high %v134_v18, %v138_v19  ;;  %v141_v24 = vld [vmem:[#allocation6 + $0x280] sm:$0xff]  ;;  %v142_v26 = vld [vmem:[#allocation6 + $0x288] sm:$0xff]  ;;  %v3126_v28 = vcombine.low %v133_v16, %v137_v17  ;;  %v3128_v29 = vcombine.low %v134_v18, %v138_v19 }
  0x4b   :  { %2428 = vmatpush1.bf16.msra.mxu0 %v3086_v47  ;;  %2551 = vmatpush1.bf16.msra.mxu1 %v3088_v48  ;;  %v145_v25 = vld [vmem:[#allocation6 + $0x2a0] sm:$0xff]  ;;  %v146_v27 = vld [vmem:[#allocation6 + $0x2a8] sm:$0xff]  ;;  %v446_v18 = vcombine.high %v3642_v59, %v3642_v59 }
  0x4c   :  { %2429 = vmatprep.subr.bf16.mxu0 %v3095_v49  ;;  %2552 = vmatprep.subr.bf16.mxu1 %v3097_v50  ;;  %v3135_v30 = vcombine.high %v141_v24, %v145_v25  ;;  %v3137_v31 = vcombine.high %v142_v26, %v146_v27  ;;  %v149_v32 = vld [vmem:[#allocation6 + $0x2c0] sm:$0xff]  ;;  %v150_v34 = vld [vmem:[#allocation6 + $0x2c8] sm:$0xff]  ;;  %v3134_v36 = vcombine.low %v141_v24, %v145_v25 }
  0x4d   :  { %v153_v33 = vld [vmem:[#allocation6 + $0x2e0] sm:$0xff]  ;;  %v154_v35 = vld [vmem:[#allocation6 + $0x2e8] sm:$0xff]  ;;  %v3136_v37 = vcombine.low %v142_v26, %v146_v27  ;;  %v460_v24 = vrot.slane %v446_v18, %v3640_v53  ;;  %v3660_v25 = vrot.slane %v3646_v63, %v3640_v53  ;;  %v3667_v63 = vcombine.high %v3651_v9, %v3651_v9 }
  0x4e   :  { %v3143_v38 = vcombine.high %v149_v32, %v153_v33  ;;  %v3145_v39 = vcombine.high %v150_v34, %v154_v35  ;;  %v157_v40 = vld [vmem:[#allocation6 + $0x300] sm:$0xff]  ;;  %v158_v42 = vld [vmem:[#allocation6 + $0x308] sm:$0xff]  ;;  %v3142_v45 = vcombine.low %v149_v32, %v153_v33  ;;  %v3144_v46 = vcombine.low %v150_v34, %v154_v35 }
  0x4f   :  { %2430 = vmatpush1.bf16.msra.mxu0 %v3094_v56  ;;  %2553 = vmatpush1.bf16.msra.mxu1 %v3096_v57  ;;  %v161_v41 = vld [vmem:[#allocation6 + $0x320] sm:$0xff]  ;;  %v162_v43 = vld [vmem:[#allocation6 + $0x328] sm:$0xff] }
  0x50   :  { %2431 = vmatprep.subr.bf16.mxu0 %v3103_v58  ;;  %2554 = vmatprep.subr.bf16.mxu1 %v3105_v60  ;;  %v3151_v47 = vcombine.high %v157_v40, %v161_v41  ;;  %v3153_v48 = vcombine.high %v158_v42, %v162_v43  ;;  %v165_v49 = vld [vmem:[#allocation6 + $0x340] sm:$0xff]  ;;  %v166_v51 = vld [vmem:[#allocation6 + $0x348] sm:$0xff]  ;;  %v3150_v54 = vcombine.low %v157_v40, %v161_v41 }
  0x51   :  { %v169_v50 = vld [vmem:[#allocation6 + $0x360] sm:$0xff]  ;;  %v170_v52 = vld [vmem:[#allocation6 + $0x368] sm:$0xff]  ;;  %v3152_v55 = vcombine.low %v158_v42, %v162_v43 }
  0x52   :  { %v3159_v56 = vcombine.high %v165_v49, %v169_v50  ;;  %v3161_v57 = vcombine.high %v166_v51, %v170_v52  ;;  %v173_v58 = vld [vmem:[#allocation6 + $0x380] sm:$0xff]  ;;  %v174_v61 = vld [vmem:[#allocation6 + $0x388] sm:$0xff]  ;;  %v3158_v0 = vcombine.low %v165_v49, %v169_v50  ;;  %v3160_v1 = vcombine.low %v166_v51, %v170_v52 }
  0x53   :  { %2432 = vmatpush1.bf16.msra.mxu0 %v3102_v2  ;;  %2555 = vmatpush1.bf16.msra.mxu1 %v3104_v4  ;;  %v177_v60 = vld [vmem:[#allocation6 + $0x3a0] sm:$0xff]  ;;  %v178_v62 = vld [vmem:[#allocation6 + $0x3a8] sm:$0xff] }
  0x54   :  { %2433 = vmatprep.subr.bf16.mxu0 %v3111_v5  ;;  %2556 = vmatprep.subr.bf16.mxu1 %v3113_v6  ;;  %v3167_v2 = vcombine.high %v173_v58, %v177_v60  ;;  %v3169_v3 = vcombine.high %v174_v61, %v178_v62  ;;  %v181_v4 = vld [vmem:[#allocation6 + $0x3c0] sm:$0xff]  ;;  %v182_v6 = vld [vmem:[#allocation6 + $0x3c8] sm:$0xff]  ;;  %v3166_v8 = vcombine.low %v173_v58, %v177_v60 }
  0x55   :  { %v185_v5 = vld [vmem:[#allocation6 + $0x3e0] sm:$0xff]  ;;  %v186_v7 = vld [vmem:[#allocation6 + $0x3e8] sm:$0xff]  ;;  %v3168_v10 = vcombine.low %v174_v61, %v178_v62 }
  0x56   :  { %v3175_v11 = vcombine.high %v181_v4, %v185_v5  ;;  %v194_v16 = vld [vmem:[#allocation6 + $0x428] sm:$0xff]  ;;  %v3174_v17 = vcombine.low %v181_v4, %v185_v5  ;;  %v3176_v19 = vcombine.low %v182_v6, %v186_v7  ;;  %v205_v33 = vld [vmem:[#allocation6 + $0x480] sm:$0xff] }
  0x57   :  { %2434 = vmatpush1.bf16.msra.mxu0 %v3110_v12  ;;  %2557 = vmatpush1.bf16.msra.mxu1 %v3112_v13  ;;  %v3177_v12 = vcombine.high %v182_v6, %v186_v7  ;;  %v189_v13 = vld [vmem:[#allocation6 + $0x400] sm:$0xff]  ;;  %v198_v26 = vld [vmem:[#allocation6 + $0x448] sm:$0xff] }
  0x58   :  { %2435 = vmatprep.subr.bf16.mxu0 %v3119_v14  ;;  %2558 = vmatprep.subr.bf16.mxu1 %v3121_v15  ;;  %v193_v14 = vld [vmem:[#allocation6 + $0x420] sm:$0xff]  ;;  %v190_v15 = vld [vmem:[#allocation6 + $0x408] sm:$0xff] }
  0x59   :  { %v202_v27 = vld [vmem:[#allocation6 + $0x468] sm:$0xff]  ;;  %v3184_v59 = vcombine.low %v190_v15, %v194_v16  ;;  %v209_v34 = vld [vmem:[#allocation6 + $0x4a0] sm:$0xff] }
  0x5a   :  { %v3193_v32 = vcombine.high %v198_v26, %v202_v27  ;;  %v3199_v40 = vcombine.high %v205_v33, %v209_v34  ;;  %v213_v42 = vld [vmem:[#allocation6 + $0x4c0] sm:$0xff]  ;;  %v222_v52 = vld [vmem:[#allocation6 + $0x508] sm:$0xff] }
  0x5b   :  { %2436 = vmatpush1.bf16.msra.mxu0 %v3118_v20  ;;  %2559 = vmatpush1.bf16.msra.mxu1 %v3120_v21  ;;  %v3183_v20 = vcombine.high %v189_v13, %v193_v14  ;;  %v3185_v21 = vcombine.high %v190_v15, %v194_v16  ;;  %v217_v43 = vld [vmem:[#allocation6 + $0x4e0] sm:$0xff]  ;;  %v230_v62 = vld [vmem:[#allocation6 + $0x548] sm:$0xff] }
  0x5c   :  { %2437 = vmatprep.subr.bf16.mxu0 %v3127_v22  ;;  %2560 = vmatprep.subr.bf16.mxu1 %v3129_v23  ;;  %v197_v22 = vld [vmem:[#allocation6 + $0x440] sm:$0xff]  ;;  %v238_v7 = vld [vmem:[#allocation6 + $0x588] sm:$0xff] }
  0x5d   :  { %v201_v23 = vld [vmem:[#allocation6 + $0x460] sm:$0xff]  ;;  %v246_v16 = vld [vmem:[#allocation6 + $0x5c8] sm:$0xff] }
  0x5e   :  { %v221_v50 = vld [vmem:[#allocation6 + $0x500] sm:$0xff] }
  0x5f   :  { %2438 = vmatpush1.bf16.msra.mxu0 %v3126_v28  ;;  %2561 = vmatpush1.bf16.msra.mxu1 %v3128_v29  ;;  %v3182_v28 = vcombine.low %v189_v13, %v193_v14  ;;  %v462_v29 = vcombine.high %v460_v24, %v460_v24  ;;  %v225_v51 = vld [vmem:[#allocation6 + $0x520] sm:$0xff] }
  0x60   :  { %2439 = vmatprep.subr.bf16.mxu0 %v3135_v30  ;;  %2562 = vmatprep.subr.bf16.mxu1 %v3137_v31  ;;  %v3191_v30 = vcombine.high %v197_v22, %v201_v23  ;;  %v3663_v31 = vrot.slane %v460_v24, %v3640_v53  ;;  %v229_v60 = vld [vmem:[#allocation6 + $0x540] sm:$0xff]  ;;  %v254_v24 = vld [vmem:[#allocation6 + $0x608] sm:$0xff] }
  0x61   :  { %v3670_v35 = vrot.slane %v462_v29, %v3640_v53  ;;  %v214_v53 = vld [vmem:[#allocation6 + $0x4c8] sm:$0xff]  ;;  %v233_v61 = vld [vmem:[#allocation6 + $0x560] sm:$0xff] }
  0x62   :  { %v237_v5 = vld [vmem:[#allocation6 + $0x580] sm:$0xff] }
  0x63   :  { %2440 = vmatpush1.bf16.msra.mxu0 %v3134_v36  ;;  %2563 = vmatpush1.bf16.msra.mxu1 %v3136_v37  ;;  %v206_v36 = vld [vmem:[#allocation6 + $0x488] sm:$0xff]  ;;  %v241_v6 = vld [vmem:[#allocation6 + $0x5a0] sm:$0xff] }
  0x64   :  { %2441 = vmatprep.subr.bf16.mxu0 %v3143_v38  ;;  %2564 = vmatprep.subr.bf16.mxu1 %v3145_v39  ;;  %v210_v37 = vld [vmem:[#allocation6 + $0x4a8] sm:$0xff]  ;;  %v3190_v38 = vcombine.low %v197_v22, %v201_v23  ;;  %v3192_v39 = vcombine.low %v198_v26, %v202_v27  ;;  %v245_v14 = vld [vmem:[#allocation6 + $0x5c0] sm:$0xff]  ;;  %v3230_v18 = vcombine.low %v237_v5, %v241_v6 }
  0x65   :  { %v3201_v41 = vcombine.high %v206_v36, %v210_v37  ;;  %v249_v15 = vld [vmem:[#allocation6 + $0x5e0] sm:$0xff]  ;;  %v258_v26 = vld [vmem:[#allocation6 + $0x628] sm:$0xff] }
  0x66   :  { %v253_v22 = vld [vmem:[#allocation6 + $0x600] sm:$0xff]  ;;  %v3238_v27 = vcombine.low %v245_v14, %v249_v15 }
  0x67   :  { %2442 = vmatpush1.bf16.msra.mxu0 %v3142_v45  ;;  %2565 = vmatpush1.bf16.msra.mxu1 %v3144_v46  ;;  %v218_v45 = vld [vmem:[#allocation6 + $0x4e8] sm:$0xff]  ;;  %v3198_v46 = vcombine.low %v205_v33, %v209_v34  ;;  %v257_v23 = vld [vmem:[#allocation6 + $0x620] sm:$0xff] }
  0x68   :  { %2443 = vmatprep.subr.bf16.mxu0 %v3151_v47  ;;  %2566 = vmatprep.subr.bf16.mxu1 %v3153_v48  ;;  %v3200_v47 = vcombine.low %v206_v36, %v210_v37  ;;  %v3207_v48 = vcombine.high %v213_v42, %v217_v43  ;;  %v3209_v49 = vcombine.high %v214_v53, %v218_v45  ;;  %v262_v33 = vld [vmem:[#allocation6 + $0x648] sm:$0xff] }
  0x69   :  { %v3247_v29 = vcombine.high %v253_v22, %v257_v23  ;;  %v266_v34 = vld [vmem:[#allocation6 + $0x668] sm:$0xff]  ;;  %v3246_v36 = vcombine.low %v253_v22, %v257_v23  ;;  %v3248_v37 = vcombine.low %v254_v24, %v258_v26 }
  0x6a   :  { %v310_v22 = vld [vmem:[#allocation6 + $0x7c8] sm:$0xff] }
  0x6b   :  { %2444 = vmatpush1.bf16.msra.mxu0 %v3150_v54  ;;  %2567 = vmatpush1.bf16.msra.mxu1 %v3152_v55  ;;  %v226_v54 = vld [vmem:[#allocation6 + $0x528] sm:$0xff]  ;;  %v3206_v55 = vcombine.low %v213_v42, %v217_v43 }
  0x6c   :  { %2445 = vmatprep.subr.bf16.mxu0 %v3159_v56  ;;  %2568 = vmatprep.subr.bf16.mxu1 %v3161_v57  ;;  %v3208_v56 = vcombine.low %v214_v53, %v218_v45  ;;  %v3215_v57 = vcombine.high %v221_v50, %v225_v51  ;;  %v3217_v58 = vcombine.high %v222_v52, %v226_v54  ;;  %v270_v42 = vld [vmem:[#allocation6 + $0x688] sm:$0xff] }
  0x6d   :  { %v274_v43 = vld [vmem:[#allocation6 + $0x6a8] sm:$0xff]  ;;  %v3256_v45 = vcombine.low %v262_v33, %v266_v34 }
  0x6e   :  { %v314_v23 = vld [vmem:[#allocation6 + $0x7e8] sm:$0xff] }
  0x6f   :  { %2446 = vmatpush1.bf16.msra.mxu0 %v3158_v0  ;;  %2569 = vmatpush1.bf16.msra.mxu1 %v3160_v1  ;;  %v234_v0 = vld [vmem:[#allocation6 + $0x568] sm:$0xff]  ;;  %v3214_v1 = vcombine.low %v221_v50, %v225_v51 }
  0x70   :  { %2447 = vmatprep.subr.bf16.mxu0 %v3167_v2  ;;  %2570 = vmatprep.subr.bf16.mxu1 %v3169_v3  ;;  %v3216_v2 = vcombine.low %v222_v52, %v226_v54  ;;  %v3223_v3 = vcombine.high %v229_v60, %v233_v61  ;;  %v3225_v4 = vcombine.high %v230_v62, %v234_v0  ;;  %v278_v50 = vld [vmem:[#allocation6 + $0x6c8] sm:$0xff] }
  0x71   :  { %v282_v51 = vld [vmem:[#allocation6 + $0x6e8] sm:$0xff]  ;;  %v3264_v54 = vcombine.low %v270_v42, %v274_v43 }
  0x73   :  { %2448 = vmatpush1.bf16.msra.mxu0 %v3166_v8  ;;  %2571 = vmatpush1.bf16.msra.mxu1 %v3168_v10  ;;  %v242_v8 = vld [vmem:[#allocation6 + $0x5a8] sm:$0xff]  ;;  %v3222_v10 = vcombine.low %v229_v60, %v233_v61 }
  0x74   :  { %2449 = vmatprep.subr.bf16.mxu0 %v3175_v11  ;;  %2572 = vmatprep.subr.bf16.mxu1 %v3177_v12  ;;  %v3224_v11 = vcombine.low %v230_v62, %v234_v0  ;;  %v3231_v12 = vcombine.high %v237_v5, %v241_v6  ;;  %v3233_v13 = vcombine.high %v238_v7, %v242_v8  ;;  %v286_v60 = vld [vmem:[#allocation6 + $0x708] sm:$0xff] }
  0x75   :  { %v290_v61 = vld [vmem:[#allocation6 + $0x728] sm:$0xff]  ;;  %v3272_v0 = vcombine.low %v278_v50, %v282_v51 }
  0x76   :  { %v294_v5 = vld [vmem:[#allocation6 + $0x748] sm:$0xff] }
  0x77   :  { %2450 = vmatpush1.bf16.msra.mxu0 %v3174_v17  ;;  %2573 = vmatpush1.bf16.msra.mxu1 %v3176_v19  ;;  %v250_v17 = vld [vmem:[#allocation6 + $0x5e8] sm:$0xff]  ;;  %v3232_v19 = vcombine.low %v238_v7, %v242_v8  ;;  %v3280_v8 = vcombine.low %v286_v60, %v290_v61 }
  0x78   :  { %2460 = vmatprep.subr.bf16.mxu0 %v3183_v20  ;;  %2583 = vmatprep.subr.bf16.mxu1 %v3185_v21  ;;  %v3239_v20 = vcombine.high %v245_v14, %v249_v15  ;;  %v3241_v21 = vcombine.high %v246_v16, %v250_v17  ;;  %v298_v6 = vld [vmem:[#allocation6 + $0x768] sm:$0xff] }
  0x79   :  { %v302_v14 = vld [vmem:[#allocation6 + $0x788] sm:$0xff] }
  0x7a   :  { %2452 = vmatmul.mubr.bf16.vlgmr.msra.gmra.mrb[0].mxu0 %v3660_v25  ;;  %2575 = vmatmul.mubr.bf16.vlgmr.msra.gmra.mrb[0].mxu1 %v3660_v25  ;;  %v306_v15 = vld [vmem:[#allocation6 + $0x7a8] sm:$0xff] }
  0x7b   :  { %2461 = vmatpush1.bf16.msra.mxu0 %v3182_v28  ;;  %2584 = vmatpush1.bf16.msra.mxu1 %v3184_v59  ;;  %v3240_v28 = vcombine.low %v246_v16, %v250_v17  ;;  %v3249_v59 = vcombine.high %v254_v24, %v258_v26  ;;  %v3288_v17 = vcombine.low %v294_v5, %v298_v6 }
  0x7c   :  { %2462 = vmatprep.subr.bf16.mxu0 %v3191_v30  ;;  %2585 = vmatprep.subr.bf16.mxu1 %v3193_v32  ;;  %v261_v30 = vld [vmem:[#allocation6 + $0x640] sm:$0xff]  ;;  %v3296_v26 = vcombine.low %v302_v14, %v306_v15 }
  0x7d   :  { %2492 = vmatprep.mubr.bf16.mxu0 %v3667_v63  ;;  %2615 = vmatprep.mubr.bf16.mxu1 %v3667_v63  ;;  %v265_v32 = vld [vmem:[#allocation6 + $0x660] sm:$0xff] }
  0x7e   :  { %v3254_v53 = vcombine.low %v261_v30, %v265_v32 }
  0x7f   :  { %2463 = vmatpush1.bf16.msra.mxu0 %v3190_v38  ;;  %2586 = vmatpush1.bf16.msra.mxu1 %v3192_v39  ;;  %v3255_v38 = vcombine.high %v261_v30, %v265_v32  ;;  %v3257_v39 = vcombine.high %v262_v33, %v266_v34  ;;  %v318_v30 = vld [vmem:[#allocation6 + $0x808] sm:$0xff]  ;;  %v3304_v34 = vcombine.low %v310_v22, %v314_v23 }
  0x80   :  { %2464 = vmatprep.subr.bf16.mxu0 %v3199_v40  ;;  %2587 = vmatprep.subr.bf16.mxu1 %v3201_v41  ;;  %v269_v40 = vld [vmem:[#allocation6 + $0x680] sm:$0xff]  ;;  %v322_v32 = vld [vmem:[#allocation6 + $0x828] sm:$0xff] }
  0x81   :  { %v273_v41 = vld [vmem:[#allocation6 + $0x6a0] sm:$0xff] }
  0x82   :  { %v3262_v52 = vcombine.low %v269_v40, %v273_v41 }
  0x83   :  { %2465 = vmatpush1.bf16.msra.mxu0 %v3198_v46  ;;  %2588 = vmatpush1.bf16.msra.mxu1 %v3200_v47  ;;  %v3263_v46 = vcombine.high %v269_v40, %v273_v41  ;;  %v3265_v47 = vcombine.high %v270_v42, %v274_v43  ;;  %v3678_v40 = vcombine.high %v3660_v25, %v3660_v25  ;;  %v326_v41 = vld [vmem:[#allocation6 + $0x848] sm:$0xff] }
  0x84   :  { %2466 = vmatprep.subr.bf16.mxu0 %v3207_v48  ;;  %2589 = vmatprep.subr.bf16.mxu1 %v3209_v49  ;;  %v277_v48 = vld [vmem:[#allocation6 + $0x6c0] sm:$0xff]  ;;  %v330_v42 = vld [vmem:[#allocation6 + $0x868] sm:$0xff] }
  0x85   :  { %v281_v49 = vld [vmem:[#allocation6 + $0x6e0] sm:$0xff] }
  0x86   :  { %v3270_v62 = vcombine.low %v277_v48, %v281_v49 }
  0x87   :  { %2467 = vmatpush1.bf16.msra.mxu0 %v3206_v55  ;;  %2590 = vmatpush1.bf16.msra.mxu1 %v3208_v56  ;;  %v3271_v55 = vcombine.high %v277_v48, %v281_v49  ;;  %v3273_v56 = vcombine.high %v278_v50, %v282_v51  ;;  %v337_v48 = vld [vmem:[#allocation6 + $0x8a0] sm:$0xff]  ;;  %v334_v49 = vld [vmem:[#allocation6 + $0x888] sm:$0xff] }
  0x88   :  { %2468 = vmatprep.subr.bf16.mxu0 %v3215_v57  ;;  %2591 = vmatprep.subr.bf16.mxu1 %v3217_v58  ;;  %v285_v57 = vld [vmem:[#allocation6 + $0x700] sm:$0xff]  ;;  %v338_v50 = vld [vmem:[#allocation6 + $0x8a8] sm:$0xff] }
  0x89   :  { %v289_v58 = vld [vmem:[#allocation6 + $0x720] sm:$0xff] }
  0x8a   :  { %v3278_v7 = vcombine.low %v285_v57, %v289_v58 }
  0x8b   :  { %2469 = vmatpush1.bf16.msra.mxu0 %v3214_v1  ;;  %2592 = vmatpush1.bf16.msra.mxu1 %v3216_v2  ;;  %v3279_v1 = vcombine.high %v285_v57, %v289_v58  ;;  %v3281_v2 = vcombine.high %v286_v60, %v290_v61  ;;  %v345_v57 = vld [vmem:[#allocation6 + $0x8e0] sm:$0xff]  ;;  %v342_v58 = vld [vmem:[#allocation6 + $0x8c8] sm:$0xff] }
  0x8c   :  { %2470 = vmatprep.subr.bf16.mxu0 %v3223_v3  ;;  %2593 = vmatprep.subr.bf16.mxu1 %v3225_v4  ;;  %v293_v3 = vld [vmem:[#allocation6 + $0x740] sm:$0xff]  ;;  %v346_v60 = vld [vmem:[#allocation6 + $0x8e8] sm:$0xff] }
  0x8d   :  { %v297_v4 = vld [vmem:[#allocation6 + $0x760] sm:$0xff] }
  0x8e   :  { %v3286_v16 = vcombine.low %v293_v3, %v297_v4 }
  0x8f   :  { %2471 = vmatpush1.bf16.msra.mxu0 %v3222_v10  ;;  %2594 = vmatpush1.bf16.msra.mxu1 %v3224_v11  ;;  %v3287_v10 = vcombine.high %v293_v3, %v297_v4  ;;  %v3289_v11 = vcombine.high %v294_v5, %v298_v6  ;;  %v353_v3 = vld [vmem:[#allocation6 + $0x920] sm:$0xff]  ;;  %v350_v4 = vld [vmem:[#allocation6 + $0x908] sm:$0xff] }
  0x90   :  { %2472 = vmatprep.subr.bf16.mxu0 %v3231_v12  ;;  %2595 = vmatprep.subr.bf16.mxu1 %v3233_v13  ;;  %v301_v12 = vld [vmem:[#allocation6 + $0x780] sm:$0xff]  ;;  %v354_v5 = vld [vmem:[#allocation6 + $0x928] sm:$0xff] }
  0x91   :  { %v305_v13 = vld [vmem:[#allocation6 + $0x7a0] sm:$0xff] }
  0x92   :  { %v3294_v24 = vcombine.low %v301_v12, %v305_v13 }
  0x93   :  { %2473 = vmatpush1.bf16.msra.mxu0 %v3230_v18  ;;  %2596 = vmatpush1.bf16.msra.mxu1 %v3232_v19  ;;  %v3295_v18 = vcombine.high %v301_v12, %v305_v13  ;;  %v3297_v19 = vcombine.high %v302_v14, %v306_v15  ;;  %v361_v12 = vld [vmem:[#allocation6 + $0x960] sm:$0xff]  ;;  %v358_v13 = vld [vmem:[#allocation6 + $0x948] sm:$0xff] }
  0x94   :  { %2474 = vmatprep.subr.bf16.mxu0 %v3239_v20  ;;  %2597 = vmatprep.subr.bf16.mxu1 %v3241_v21  ;;  %v309_v20 = vld [vmem:[#allocation6 + $0x7c0] sm:$0xff]  ;;  %v362_v14 = vld [vmem:[#allocation6 + $0x968] sm:$0xff] }
  0x95   :  { %v313_v21 = vld [vmem:[#allocation6 + $0x7e0] sm:$0xff] }
  0x96   :  { %v3302_v33 = vcombine.low %v309_v20, %v313_v21 }
  0x97   :  { %2475 = vmatpush1.bf16.msra.mxu0 %v3238_v27  ;;  %2598 = vmatpush1.bf16.msra.mxu1 %v3240_v28  ;;  %v3303_v27 = vcombine.high %v309_v20, %v313_v21  ;;  %v3305_v28 = vcombine.high %v310_v22, %v314_v23  ;;  %v369_v20 = vld [vmem:[#allocation6 + $0x9a0] sm:$0xff]  ;;  %v366_v21 = vld [vmem:[#allocation6 + $0x988] sm:$0xff] }
  0x98   :  { %2476 = vmatprep.subr.bf16.mxu0 %v3247_v29  ;;  %2599 = vmatprep.subr.bf16.mxu1 %v3249_v59  ;;  %v317_v29 = vld [vmem:[#allocation6 + $0x800] sm:$0xff]  ;;  %v370_v22 = vld [vmem:[#allocation6 + $0x9a8] sm:$0xff] }
  0x99   :  { %v321_v59 = vld [vmem:[#allocation6 + $0x820] sm:$0xff] }
  0x9a   :  { %v3310_v43 = vcombine.low %v317_v29, %v321_v59 }
  0x9b   :  { %2477 = vmatpush1.bf16.msra.mxu0 %v3246_v36  ;;  %2600 = vmatpush1.bf16.msra.mxu1 %v3248_v37  ;;  %v3311_v36 = vcombine.high %v317_v29, %v321_v59  ;;  %v3313_v37 = vcombine.high %v318_v30, %v322_v32  ;;  %v377_v29 = vld [vmem:[#allocation6 + $0x9e0] sm:$0xff]  ;;  %v374_v59 = vld [vmem:[#allocation6 + $0x9c8] sm:$0xff] }
  0x9c   :  { %2478 = vmatprep.subr.bf16.mxu0 %v3255_v38  ;;  %2601 = vmatprep.subr.bf16.mxu1 %v3257_v39  ;;  %v325_v38 = vld [vmem:[#allocation6 + $0x840] sm:$0xff] }
  0x9d   :  { %v329_v39 = vld [vmem:[#allocation6 + $0x860] sm:$0xff] }
  0x9e   :  { %v3318_v51 = vcombine.low %v325_v38, %v329_v39 }
  0x9f   :  { %2479 = vmatpush1.bf16.msra.mxu0 %v3254_v53  ;;  %2602 = vmatpush1.bf16.msra.mxu1 %v3256_v45  ;;  %v3312_v53 = vcombine.low %v318_v30, %v322_v32  ;;  %v3319_v45 = vcombine.high %v325_v38, %v329_v39  ;;  %v378_v30 = vld [vmem:[#allocation6 + $0x9e8] sm:$0xff]  ;;  %v385_v38 = vld [vmem:[#allocation6 + $0xa20] sm:$0xff] }
  0xa0   :  { %2480 = vmatprep.subr.bf16.mxu0 %v3263_v46  ;;  %2603 = vmatprep.subr.bf16.mxu1 %v3265_v47  ;;  %v3321_v46 = vcombine.high %v326_v41, %v330_v42  ;;  %v333_v47 = vld [vmem:[#allocation6 + $0x880] sm:$0xff]  ;;  %v382_v39 = vld [vmem:[#allocation6 + $0xa08] sm:$0xff] }
  0xa1   :  { %v3326_v61 = vcombine.low %v333_v47, %v337_v48 }
  0xa3   :  { %2481 = vmatpush1.bf16.msra.mxu0 %v3262_v52  ;;  %2604 = vmatpush1.bf16.msra.mxu1 %v3264_v54  ;;  %v3320_v52 = vcombine.low %v326_v41, %v330_v42  ;;  %v3327_v54 = vcombine.high %v333_v47, %v337_v48  ;;  %v386_v41 = vld [vmem:[#allocation6 + $0xa28] sm:$0xff]  ;;  %v393_v47 = vld [vmem:[#allocation6 + $0xa60] sm:$0xff] }
  0xa4   :  { %2482 = vmatprep.subr.bf16.mxu0 %v3271_v55  ;;  %2605 = vmatprep.subr.bf16.mxu1 %v3273_v56  ;;  %v3329_v55 = vcombine.high %v334_v49, %v338_v50  ;;  %v341_v56 = vld [vmem:[#allocation6 + $0x8c0] sm:$0xff]  ;;  %v390_v48 = vld [vmem:[#allocation6 + $0xa48] sm:$0xff] }
  0xa5   :  { %v3334_v6 = vcombine.low %v341_v56, %v345_v57 }
  0xa7   :  { %2483 = vmatpush1.bf16.msra.mxu0 %v3270_v62  ;;  %2606 = vmatpush1.bf16.msra.mxu1 %v3272_v0  ;;  %v3328_v62 = vcombine.low %v334_v49, %v338_v50  ;;  %v3335_v0 = vcombine.high %v341_v56, %v345_v57  ;;  %v394_v49 = vld [vmem:[#allocation6 + $0xa68] sm:$0xff]  ;;  %v401_v56 = vld [vmem:[#allocation6 + $0xaa0] sm:$0xff] }
  0xa8   :  { %2484 = vmatprep.subr.bf16.mxu0 %v3279_v1  ;;  %2607 = vmatprep.subr.bf16.mxu1 %v3281_v2  ;;  %v3337_v1 = vcombine.high %v342_v58, %v346_v60  ;;  %v349_v2 = vld [vmem:[#allocation6 + $0x900] sm:$0xff]  ;;  %v398_v57 = vld [vmem:[#allocation6 + $0xa88] sm:$0xff] }
  0xa9   :  { %v3342_v15 = vcombine.low %v349_v2, %v353_v3 }
  0xab   :  { %2485 = vmatpush1.bf16.msra.mxu0 %v3278_v7  ;;  %2608 = vmatpush1.bf16.msra.mxu1 %v3280_v8  ;;  %v3336_v7 = vcombine.low %v342_v58, %v346_v60  ;;  %v3343_v8 = vcombine.high %v349_v2, %v353_v3  ;;  %v402_v58 = vld [vmem:[#allocation6 + $0xaa8] sm:$0xff]  ;;  %v409_v2 = vld [vmem:[#allocation6 + $0xae0] sm:$0xff] }
  0xac   :  { %2486 = vmatprep.subr.bf16.mxu0 %v3287_v10  ;;  %2609 = vmatprep.subr.bf16.mxu1 %v3289_v11  ;;  %v3345_v10 = vcombine.high %v350_v4, %v354_v5  ;;  %v357_v11 = vld [vmem:[#allocation6 + $0x940] sm:$0xff]  ;;  %v406_v3 = vld [vmem:[#allocation6 + $0xac8] sm:$0xff] }
  0xad   :  { %v3350_v23 = vcombine.low %v357_v11, %v361_v12 }
  0xaf   :  { %2487 = vmatpush1.bf16.msra.mxu0 %v3286_v16  ;;  %2610 = vmatpush1.bf16.msra.mxu1 %v3288_v17  ;;  %v3344_v16 = vcombine.low %v350_v4, %v354_v5  ;;  %v3351_v17 = vcombine.high %v357_v11, %v361_v12  ;;  %v410_v4 = vld [vmem:[#allocation6 + $0xae8] sm:$0xff]  ;;  %v417_v11 = vld [vmem:[#allocation6 + $0xb20] sm:$0xff] }
  0xb0   :  { %2488 = vmatprep.subr.bf16.mxu0 %v3295_v18  ;;  %2611 = vmatprep.subr.bf16.mxu1 %v3297_v19  ;;  %v3353_v18 = vcombine.high %v358_v13, %v362_v14  ;;  %v365_v19 = vld [vmem:[#allocation6 + $0x980] sm:$0xff]  ;;  %v414_v12 = vld [vmem:[#allocation6 + $0xb08] sm:$0xff] }
  0xb1   :  { %v3358_v32 = vcombine.low %v365_v19, %v369_v20 }
  0xb3   :  { %2489 = vmatpush1.bf16.msra.mxu0 %v3294_v24  ;;  %2612 = vmatpush1.bf16.msra.mxu1 %v3296_v26  ;;  %v3352_v24 = vcombine.low %v358_v13, %v362_v14  ;;  %v3359_v26 = vcombine.high %v365_v19, %v369_v20  ;;  %v418_v13 = vld [vmem:[#allocation6 + $0xb28] sm:$0xff]  ;;  %v425_v19 = vld [vmem:[#allocation6 + $0xb60] sm:$0xff] }
  0xb4   :  { %2490 = vmatprep.subr.bf16.mxu0 %v3303_v27  ;;  %2613 = vmatprep.subr.bf16.mxu1 %v3305_v28  ;;  %v3361_v27 = vcombine.high %v366_v21, %v370_v22  ;;  %v373_v28 = vld [vmem:[#allocation6 + $0x9c0] sm:$0xff]  ;;  %v422_v20 = vld [vmem:[#allocation6 + $0xb48] sm:$0xff] }
  0xb5   :  { %v3366_v42 = vcombine.low %v373_v28, %v377_v29 }
  0xb7   :  { %2491 = vmatpush1.bf16.msra.mxu0 %v3302_v33  ;;  %2614 = vmatpush1.bf16.msra.mxu1 %v3304_v34  ;;  %v3360_v33 = vcombine.low %v366_v21, %v370_v22  ;;  %v3367_v34 = vcombine.high %v373_v28, %v377_v29  ;;  %v426_v21 = vld [vmem:[#allocation6 + $0xb68] sm:$0xff]  ;;  %v433_v28 = vld [vmem:[#allocation6 + $0xba0] sm:$0xff] }
  0xb8   :  { %2501 = vmatprep.subr.bf16.mxu0 %v3311_v36  ;;  %2624 = vmatprep.subr.bf16.mxu1 %v3313_v37  ;;  %v3369_v36 = vcombine.high %v374_v59, %v378_v30  ;;  %v381_v37 = vld [vmem:[#allocation6 + $0xa00] sm:$0xff]  ;;  %v430_v29 = vld [vmem:[#allocation6 + $0xb88] sm:$0xff] }
  0xb9   :  { %v3374_v50 = vcombine.low %v381_v37, %v385_v38 }
  0xba   :  { %2493 = vmatmul.mubr.bf16.vlgmr.msra.gmra.mrb[0].mxu0 %v3678_v40  ;;  %2616 = vmatmul.mubr.bf16.vlgmr.msra.gmra.mrb[0].mxu1 %v3678_v40 }
  0xbb   :  { %2502 = vmatpush1.bf16.msra.mxu0 %v3310_v43  ;;  %2625 = vmatpush1.bf16.msra.mxu1 %v3312_v53  ;;  %v3368_v43 = vcombine.low %v374_v59, %v378_v30  ;;  %v3375_v53 = vcombine.high %v381_v37, %v385_v38  ;;  %v434_v59 = vld [vmem:[#allocation6 + $0xba8] sm:$0xff]  ;;  %v441_v37 = vld [vmem:[#allocation6 + $0xbe0] sm:$0xff] }
  0xbc   :  { %2503 = vmatprep.subr.bf16.mxu0 %v3319_v45  ;;  %2626 = vmatprep.subr.bf16.mxu1 %v3321_v46  ;;  %v3377_v45 = vcombine.high %v382_v39, %v386_v41  ;;  %v389_v46 = vld [vmem:[#allocation6 + $0xa40] sm:$0xff]  ;;  %v438_v38 = vld [vmem:[#allocation6 + $0xbc8] sm:$0xff] }
  0xbd   :  { %2533 = vmatprep.mubr.bf16.mxu0 %v3670_v35  ;;  %2656 = vmatprep.mubr.bf16.mxu1 %v3670_v35  ;;  %v3382_v60 = vcombine.low %v389_v46, %v393_v47 }
  0xbf   :  { %2504 = vmatpush1.bf16.msra.mxu0 %v3318_v51  ;;  %2627 = vmatpush1.bf16.msra.mxu1 %v3320_v52  ;;  %v3376_v51 = vcombine.low %v382_v39, %v386_v41  ;;  %v3383_v52 = vcombine.high %v389_v46, %v393_v47  ;;  %v442_v39 = vld [vmem:[#allocation6 + $0xbe8] sm:$0xff]  ;;  %v67_v46 = vld [vmem:[#allocation6 + $0x30] sm:$0xff]  ;;  %v64_v47 = vld [vmem:[#allocation6 + $0x18] sm:$0xff] }
  0xc0   :  { %2505 = vmatprep.subr.bf16.mxu0 %v3327_v54  ;;  %2628 = vmatprep.subr.bf16.mxu1 %v3329_v55  ;;  %v3385_v54 = vcombine.high %v390_v48, %v394_v49  ;;  %v397_v55 = vld [vmem:[#allocation6 + $0xa80] sm:$0xff] }
  0xc1   :  { %v3390_v5 = vcombine.low %v397_v55, %v401_v56 }
  0xc3   :  { %2506 = vmatpush1.bf16.msra.mxu0 %v3326_v61  ;;  %2629 = vmatpush1.bf16.msra.mxu1 %v3328_v62  ;;  %v3384_v61 = vcombine.low %v390_v48, %v394_v49  ;;  %v3391_v62 = vcombine.high %v397_v55, %v401_v56  ;;  %v68_v48 = vld [vmem:[#allocation6 + $0x38] sm:$0xff]  ;;  %v75_v55 = vld [vmem:[#allocation6 + $0x70] sm:$0xff] }
  0xc4   :  { %2507 = vmatprep.subr.bf16.mxu0 %v3335_v0  ;;  %2630 = vmatprep.subr.bf16.mxu1 %v3337_v1  ;;  %v3393_v0 = vcombine.high %v398_v57, %v402_v58  ;;  %v405_v1 = vld [vmem:[#allocation6 + $0xac0] sm:$0xff]  ;;  %v72_v56 = vld [vmem:[#allocation6 + $0x58] sm:$0xff] }
  0xc5   :  { %v3398_v14 = vcombine.low %v405_v1, %v409_v2 }
  0xc7   :  { %2508 = vmatpush1.bf16.msra.mxu0 %v3334_v6  ;;  %2631 = vmatpush1.bf16.msra.mxu1 %v3336_v7  ;;  %v3392_v6 = vcombine.low %v398_v57, %v402_v58  ;;  %v3399_v7 = vcombine.high %v405_v1, %v409_v2  ;;  %v76_v57 = vld [vmem:[#allocation6 + $0x78] sm:$0xff]  ;;  %v83_v1 = vld [vmem:[#allocation6 + $0xb0] sm:$0xff] }
  0xc8   :  { %2509 = vmatprep.subr.bf16.mxu0 %v3343_v8  ;;  %2632 = vmatprep.subr.bf16.mxu1 %v3345_v10  ;;  %v3401_v8 = vcombine.high %v406_v3, %v410_v4  ;;  %v413_v10 = vld [vmem:[#allocation6 + $0xb00] sm:$0xff]  ;;  %v80_v2 = vld [vmem:[#allocation6 + $0x98] sm:$0xff] }
  0xc9   :  { %v3406_v22 = vcombine.low %v413_v10, %v417_v11 }
  0xcb   :  { %2510 = vmatpush1.bf16.msra.mxu0 %v3342_v15  ;;  %2633 = vmatpush1.bf16.msra.mxu1 %v3344_v16  ;;  %v3400_v15 = vcombine.low %v406_v3, %v410_v4  ;;  %v3407_v16 = vcombine.high %v413_v10, %v417_v11  ;;  %v84_v3 = vld [vmem:[#allocation6 + $0xb8] sm:$0xff]  ;;  %v91_v10 = vld [vmem:[#allocation6 + $0xf0] sm:$0xff] }
  0xcc   :  { %2511 = vmatprep.subr.bf16.mxu0 %v3351_v17  ;;  %2634 = vmatprep.subr.bf16.mxu1 %v3353_v18  ;;  %v3409_v17 = vcombine.high %v414_v12, %v418_v13  ;;  %v421_v18 = vld [vmem:[#allocation6 + $0xb40] sm:$0xff]  ;;  %v88_v11 = vld [vmem:[#allocation6 + $0xd8] sm:$0xff] }
  0xcd   :  { %v3414_v30 = vcombine.low %v421_v18, %v425_v19 }
  0xcf   :  { %2512 = vmatpush1.bf16.msra.mxu0 %v3350_v23  ;;  %2635 = vmatpush1.bf16.msra.mxu1 %v3352_v24  ;;  %v3408_v23 = vcombine.low %v414_v12, %v418_v13  ;;  %v3415_v24 = vcombine.high %v421_v18, %v425_v19  ;;  %v92_v12 = vld [vmem:[#allocation6 + $0xf8] sm:$0xff]  ;;  %v99_v18 = vld [vmem:[#allocation6 + $0x130] sm:$0xff] }
  0xd0   :  { %2513 = vmatprep.subr.bf16.mxu0 %v3359_v26  ;;  %2636 = vmatprep.subr.bf16.mxu1 %v3361_v27  ;;  %v3417_v26 = vcombine.high %v422_v20, %v426_v21  ;;  %v429_v27 = vld [vmem:[#allocation6 + $0xb80] sm:$0xff]  ;;  %v96_v19 = vld [vmem:[#allocation6 + $0x118] sm:$0xff] }
  0xd1   :  { %v3422_v41 = vcombine.low %v429_v27, %v433_v28 }
  0xd3   :  { %2514 = vmatpush1.bf16.msra.mxu0 %v3358_v32  ;;  %2637 = vmatpush1.bf16.msra.mxu1 %v3360_v33  ;;  %v3416_v32 = vcombine.low %v422_v20, %v426_v21  ;;  %v3423_v33 = vcombine.high %v429_v27, %v433_v28  ;;  %v100_v20 = vld [vmem:[#allocation6 + $0x138] sm:$0xff] }
  0xd4   :  { %2515 = vmatprep.subr.bf16.mxu0 %v3367_v34  ;;  %2638 = vmatprep.subr.bf16.mxu1 %v3369_v36  ;;  %v3425_v34 = vcombine.high %v430_v29, %v434_v59  ;;  %v437_v36 = vld [vmem:[#allocation6 + $0xbc0] sm:$0xff]  ;;  %v104_v27 = vld [vmem:[#allocation6 + $0x158] sm:$0xff] }
  0xd5   :  { %v3430_v49 = vcombine.low %v437_v36, %v441_v37  ;;  %v108_v28 = vld [vmem:[#allocation6 + $0x178] sm:$0xff] }
  0xd7   :  { %2516 = vmatpush1.bf16.msra.mxu0 %v3366_v42  ;;  %2639 = vmatpush1.bf16.msra.mxu1 %v3368_v43  ;;  %v3424_v42 = vcombine.low %v430_v29, %v434_v59  ;;  %v3431_v43 = vcombine.high %v437_v36, %v441_v37  ;;  %v3092_v59 = vcombine.low %v96_v19, %v100_v20  ;;  %v112_v36 = vld [vmem:[#allocation6 + $0x198] sm:$0xff] }
  0xd8   :  { %2517 = vmatprep.subr.bf16.mxu0 %v3375_v53  ;;  %2640 = vmatprep.subr.bf16.mxu1 %v3377_v45  ;;  %v3433_v53 = vcombine.high %v438_v38, %v442_v39  ;;  %v63_v45 = vld [vmem:[#allocation6 + $0x10] sm:$0xff]  ;;  %v116_v37 = vld [vmem:[#allocation6 + $0x1b8] sm:$0xff] }
  0xd9   :  { %v3058_v58 = vcombine.low %v63_v45, %v67_v46 }
  0xdb   :  { %2518 = vmatpush1.bf16.msra.mxu0 %v3374_v50  ;;  %2641 = vmatpush1.bf16.msra.mxu1 %v3376_v51  ;;  %v3432_v50 = vcombine.low %v438_v38, %v442_v39  ;;  %v3059_v51 = vcombine.high %v63_v45, %v67_v46  ;;  %v3100_v39 = vcombine.low %v104_v27, %v108_v28  ;;  %v120_v45 = vld [vmem:[#allocation6 + $0x1d8] sm:$0xff] }
  0xdc   :  { %2519 = vmatprep.subr.bf16.mxu0 %v3383_v52  ;;  %2642 = vmatprep.subr.bf16.mxu1 %v3385_v54  ;;  %v3061_v52 = vcombine.high %v64_v47, %v68_v48  ;;  %v71_v54 = vld [vmem:[#allocation6 + $0x50] sm:$0xff]  ;;  %v124_v46 = vld [vmem:[#allocation6 + $0x1f8] sm:$0xff] }
  0xdd   :  { %v3066_v4 = vcombine.low %v71_v54, %v75_v55 }
  0xdf   :  { %2520 = vmatpush1.bf16.msra.mxu0 %v3382_v60  ;;  %2643 = vmatpush1.bf16.msra.mxu1 %v3384_v61  ;;  %v3060_v60 = vcombine.low %v64_v47, %v68_v48  ;;  %v3067_v61 = vcombine.high %v71_v54, %v75_v55  ;;  %v3108_v48 = vcombine.low %v112_v36, %v116_v37  ;;  %v128_v54 = vld [vmem:[#allocation6 + $0x218] sm:$0xff] }
  0xe0   :  { %2521 = vmatprep.subr.bf16.mxu0 %v3391_v62  ;;  %2644 = vmatprep.subr.bf16.mxu1 %v3393_v0  ;;  %v3069_v62 = vcombine.high %v72_v56, %v76_v57  ;;  %v79_v0 = vld [vmem:[#allocation6 + $0x90] sm:$0xff]  ;;  %v132_v55 = vld [vmem:[#allocation6 + $0x238] sm:$0xff] }
  0xe1   :  { %v3074_v13 = vcombine.low %v79_v0, %v83_v1 }
  0xe3   :  { %2522 = vmatpush1.bf16.msra.mxu0 %v3390_v5  ;;  %2645 = vmatpush1.bf16.msra.mxu1 %v3392_v6  ;;  %v3068_v5 = vcombine.low %v72_v56, %v76_v57  ;;  %v3075_v6 = vcombine.high %v79_v0, %v83_v1  ;;  %v3116_v57 = vcombine.low %v120_v45, %v124_v46  ;;  %v136_v0 = vld [vmem:[#allocation6 + $0x258] sm:$0xff] }
  0xe4   :  { %2523 = vmatprep.subr.bf16.mxu0 %v3399_v7  ;;  %2646 = vmatprep.subr.bf16.mxu1 %v3401_v8  ;;  %v3077_v7 = vcombine.high %v80_v2, %v84_v3  ;;  %v87_v8 = vld [vmem:[#allocation6 + $0xd0] sm:$0xff]  ;;  %v140_v1 = vld [vmem:[#allocation6 + $0x278] sm:$0xff] }
  0xe5   :  { %v3082_v21 = vcombine.low %v87_v8, %v91_v10 }
  0xe7   :  { %2524 = vmatpush1.bf16.msra.mxu0 %v3398_v14  ;;  %2647 = vmatpush1.bf16.msra.mxu1 %v3400_v15  ;;  %v3076_v14 = vcombine.low %v80_v2, %v84_v3  ;;  %v3083_v15 = vcombine.high %v87_v8, %v91_v10  ;;  %v3124_v3 = vcombine.low %v128_v54, %v132_v55  ;;  %v144_v8 = vld [vmem:[#allocation6 + $0x298] sm:$0xff] }
  0xe8   :  { %2525 = vmatprep.subr.bf16.mxu0 %v3407_v16  ;;  %2648 = vmatprep.subr.bf16.mxu1 %v3409_v17  ;;  %v3085_v16 = vcombine.high %v88_v11, %v92_v12  ;;  %v95_v17 = vld [vmem:[#allocation6 + $0x110] sm:$0xff]  ;;  %v148_v10 = vld [vmem:[#allocation6 + $0x2b8] sm:$0xff] }
  0xe9   :  { %v3090_v29 = vcombine.low %v95_v17, %v99_v18 }
  0xeb   :  { %2526 = vmatpush1.bf16.msra.mxu0 %v3406_v22  ;;  %2649 = vmatpush1.bf16.msra.mxu1 %v3408_v23  ;;  %v3084_v22 = vcombine.low %v88_v11, %v92_v12  ;;  %v3091_v23 = vcombine.high %v95_v17, %v99_v18  ;;  %v3132_v12 = vcombine.low %v136_v0, %v140_v1  ;;  %v152_v17 = vld [vmem:[#allocation6 + $0x2d8] sm:$0xff] }
  0xec   :  { %2527 = vmatprep.subr.bf16.mxu0 %v3415_v24  ;;  %2650 = vmatprep.subr.bf16.mxu1 %v3417_v26  ;;  %v103_v24 = vld [vmem:[#allocation6 + $0x150] sm:$0xff]  ;;  %v156_v18 = vld [vmem:[#allocation6 + $0x2f8] sm:$0xff] }
  0xed   :  { %v107_v26 = vld [vmem:[#allocation6 + $0x170] sm:$0xff] }
  0xee   :  { %v3098_v38 = vcombine.low %v103_v24, %v107_v26 }
  0xef   :  { %2528 = vmatpush1.bf16.msra.mxu0 %v3414_v30  ;;  %2651 = vmatpush1.bf16.msra.mxu1 %v3416_v32  ;;  %v3099_v30 = vcombine.high %v103_v24, %v107_v26  ;;  %v3101_v32 = vcombine.high %v104_v27, %v108_v28  ;;  %v160_v24 = vld [vmem:[#allocation6 + $0x318] sm:$0xff]  ;;  %v3148_v28 = vcombine.low %v152_v17, %v156_v18 }
  0xf0   :  { %2529 = vmatprep.subr.bf16.mxu0 %v3423_v33  ;;  %2652 = vmatprep.subr.bf16.mxu1 %v3425_v34  ;;  %v111_v33 = vld [vmem:[#allocation6 + $0x190] sm:$0xff]  ;;  %v164_v26 = vld [vmem:[#allocation6 + $0x338] sm:$0xff] }
  0xf1   :  { %v115_v34 = vld [vmem:[#allocation6 + $0x1b0] sm:$0xff] }
  0xf2   :  { %v3106_v47 = vcombine.low %v111_v33, %v115_v34 }
  0xf3   :  { %2530 = vmatpush1.bf16.msra.mxu0 %v3422_v41  ;;  %2653 = vmatpush1.bf16.msra.mxu1 %v3424_v42  ;;  %v3107_v41 = vcombine.high %v111_v33, %v115_v34  ;;  %v3109_v42 = vcombine.high %v112_v36, %v116_v37  ;;  %v168_v33 = vld [vmem:[#allocation6 + $0x358] sm:$0xff]  ;;  %v3156_v37 = vcombine.low %v160_v24, %v164_v26 }
  0xf4   :  { %2531 = vmatprep.subr.bf16.mxu0 %v3431_v43  ;;  %2654 = vmatprep.subr.bf16.mxu1 %v3433_v53  ;;  %v119_v43 = vld [vmem:[#allocation6 + $0x1d0] sm:$0xff]  ;;  %v172_v34 = vld [vmem:[#allocation6 + $0x378] sm:$0xff] }
  0xf5   :  { %v123_v53 = vld [vmem:[#allocation6 + $0x1f0] sm:$0xff] }
  0xf6   :  { %v3114_v56 = vcombine.low %v119_v43, %v123_v53 }
  0xf7   :  { %2532 = vmatpush1.bf16.msra.mxu0 %v3430_v49  ;;  %2655 = vmatpush1.bf16.msra.mxu1 %v3432_v50  ;;  %v3115_v49 = vcombine.high %v119_v43, %v123_v53  ;;  %v3117_v50 = vcombine.high %v120_v45, %v124_v46  ;;  %v176_v43 = vld [vmem:[#allocation6 + $0x398] sm:$0xff]  ;;  %v3164_v46 = vcombine.low %v168_v33, %v172_v34 }
  0xf8   :  { %2665 = vmatprep.subr.bf16.mxu0 %v3059_v51  ;;  %2788 = vmatprep.subr.bf16.mxu1 %v3061_v52  ;;  %v127_v51 = vld [vmem:[#allocation6 + $0x210] sm:$0xff]  ;;  %v180_v53 = vld [vmem:[#allocation6 + $0x3b8] sm:$0xff] }
  0xf9   :  { %v131_v52 = vld [vmem:[#allocation6 + $0x230] sm:$0xff] }
  0xfa   :  { %2534 = vmatmul.mubr.bf16.vlgmr.msra.gmra.mrb[0].mxu0 %v3663_v31  ;;  %2657 = vmatmul.mubr.bf16.vlgmr.msra.gmra.mrb[0].mxu1 %v3663_v31  ;;  %v3122_v2 = vcombine.low %v127_v51, %v131_v52 }
  0xfb   :  { %2666 = vmatpush1.bf16.msra.mxu0 %v3058_v58  ;;  %2789 = vmatpush1.bf16.msra.mxu1 %v3060_v60  ;;  %v3123_v58 = vcombine.high %v127_v51, %v131_v52  ;;  %v3125_v60 = vcombine.high %v128_v54, %v132_v55  ;;  %v184_v51 = vld [vmem:[#allocation6 + $0x3d8] sm:$0xff]  ;;  %v3172_v55 = vcombine.low %v176_v43, %v180_v53 }
  0xfc   :  { %2667 = vmatprep.subr.bf16.mxu0 %v3067_v61  ;;  %2790 = vmatprep.subr.bf16.mxu1 %v3069_v62  ;;  %v135_v61 = vld [vmem:[#allocation6 + $0x250] sm:$0xff]  ;;  %v188_v52 = vld [vmem:[#allocation6 + $0x3f8] sm:$0xff] }
  0xfd   :  { %2697 = vmatprep.mubr.bf16.mxu0 %v3651_v9  ;;  %2820 = vmatprep.mubr.bf16.mxu1 %v3651_v9  ;;  %v3093_v9 = vcombine.high %v96_v19, %v100_v20  ;;  %v139_v62 = vld [vmem:[#allocation6 + $0x270] sm:$0xff]  ;;  %v3140_v20 = vcombine.low %v144_v8, %v148_v10 }
  0xfe   :  { %v3130_v11 = vcombine.low %v135_v61, %v139_v62 }
  0xff   :  { %2668 = vmatpush1.bf16.msra.mxu0 %v3066_v4  ;;  %2791 = vmatpush1.bf16.msra.mxu1 %v3068_v5  ;;  %v3131_v4 = vcombine.high %v135_v61, %v139_v62  ;;  %v3133_v5 = vcombine.high %v136_v0, %v140_v1  ;;  %v192_v61 = vld [vmem:[#allocation6 + $0x418] sm:$0xff]  ;;  %v3180_v1 = vcombine.low %v184_v51, %v188_v52 }
 0x100   :  { %2669 = vmatprep.subr.bf16.mxu0 %v3075_v6  ;;  %2792 = vmatprep.subr.bf16.mxu1 %v3077_v7  ;;  %v143_v6 = vld [vmem:[#allocation6 + $0x290] sm:$0xff]  ;;  %v196_v62 = vld [vmem:[#allocation6 + $0x438] sm:$0xff] }
 0x101   :  { %v147_v7 = vld [vmem:[#allocation6 + $0x2b0] sm:$0xff] }
 0x102   :  { %v3138_v19 = vcombine.low %v143_v6, %v147_v7 }
 0x103   :  { %2670 = vmatpush1.bf16.msra.mxu0 %v3074_v13  ;;  %2793 = vmatpush1.bf16.msra.mxu1 %v3076_v14  ;;  %v3139_v13 = vcombine.high %v143_v6, %v147_v7  ;;  %v3141_v14 = vcombine.high %v144_v8, %v148_v10  ;;  %v200_v6 = vld [vmem:[#allocation6 + $0x458] sm:$0xff]  ;;  %v3188_v10 = vcombine.low %v192_v61, %v196_v62 }
 0x104   :  { %2671 = vmatprep.subr.bf16.mxu0 %v3083_v15  ;;  %2794 = vmatprep.subr.bf16.mxu1 %v3085_v16  ;;  %v151_v15 = vld [vmem:[#allocation6 + $0x2d0] sm:$0xff]  ;;  %v204_v7 = vld [vmem:[#allocation6 + $0x478] sm:$0xff] }
 0x105   :  { %v155_v16 = vld [vmem:[#allocation6 + $0x2f0] sm:$0xff] }
 0x106   :  { %v3146_v27 = vcombine.low %v151_v15, %v155_v16 }
 0x107   :  { %2672 = vmatpush1.bf16.msra.mxu0 %v3082_v21  ;;  %2795 = vmatpush1.bf16.msra.mxu1 %v3084_v22  ;;  %v3147_v21 = vcombine.high %v151_v15, %v155_v16  ;;  %v3149_v22 = vcombine.high %v152_v17, %v156_v18  ;;  %v208_v15 = vld [vmem:[#allocation6 + $0x498] sm:$0xff]  ;;  %v3196_v18 = vcombine.low %v200_v6, %v204_v7 }
 0x108   :  { %2673 = vmatprep.subr.bf16.mxu0 %v3091_v23  ;;  %2796 = vmatprep.subr.bf16.mxu1 %v3093_v9  ;;  %v159_v23 = vld [vmem:[#allocation6 + $0x310] sm:$0xff]  ;;  %v212_v16 = vld [vmem:[#allocation6 + $0x4b8] sm:$0xff] }
 0x109   :  { %v163_v9 = vld [vmem:[#allocation6 + $0x330] sm:$0xff] }
 0x10a   :  { %v3154_v36 = vcombine.low %v159_v23, %v163_v9 }
 0x10b   :  { %2674 = vmatpush1.bf16.msra.mxu0 %v3090_v29  ;;  %2797 = vmatpush1.bf16.msra.mxu1 %v3092_v59  ;;  %v3155_v29 = vcombine.high %v159_v23, %v163_v9  ;;  %v3157_v59 = vcombine.high %v160_v24, %v164_v26  ;;  %v216_v23 = vld [vmem:[#allocation6 + $0x4d8] sm:$0xff] }
 0x10c   :  { %2675 = vmatprep.subr.bf16.mxu0 %v3099_v30  ;;  %2798 = vmatprep.subr.bf16.mxu1 %v3101_v32  ;;  %v167_v30 = vld [vmem:[#allocation6 + $0x350] sm:$0xff]  ;;  %v220_v9 = vld [vmem:[#allocation6 + $0x4f8] sm:$0xff] }
 0x10d   :  { %v171_v32 = vld [vmem:[#allocation6 + $0x370] sm:$0xff] }
 0x10e   :  { %v3162_v45 = vcombine.low %v167_v30, %v171_v32 }
 0x10f   :  { %2676 = vmatpush1.bf16.msra.mxu0 %v3098_v38  ;;  %2799 = vmatpush1.bf16.msra.mxu1 %v3100_v39  ;;  %v3163_v38 = vcombine.high %v167_v30, %v171_v32  ;;  %v3165_v39 = vcombine.high %v168_v33, %v172_v34  ;;  %v228_v30 = vld [vmem:[#allocation6 + $0x538] sm:$0xff]  ;;  %v3212_v33 = vcombine.low %v216_v23, %v220_v9 }
 0x110   :  { %2677 = vmatprep.subr.bf16.mxu0 %v3107_v41  ;;  %2800 = vmatprep.subr.bf16.mxu1 %v3109_v42  ;;  %v175_v41 = vld [vmem:[#allocation6 + $0x390] sm:$0xff] }
 0x111   :  { %v179_v42 = vld [vmem:[#allocation6 + $0x3b0] sm:$0xff] }
 0x112   :  { %v3170_v54 = vcombine.low %v175_v41, %v179_v42 }
 0x113   :  { %2678 = vmatpush1.bf16.msra.mxu0 %v3106_v47  ;;  %2801 = vmatpush1.bf16.msra.mxu1 %v3108_v48  ;;  %v3171_v47 = vcombine.high %v175_v41, %v179_v42  ;;  %v3173_v48 = vcombine.high %v176_v43, %v180_v53 }
 0x114   :  { %2679 = vmatprep.subr.bf16.mxu0 %v3115_v49  ;;  %2802 = vmatprep.subr.bf16.mxu1 %v3117_v50  ;;  %v183_v49 = vld [vmem:[#allocation6 + $0x3d0] sm:$0xff] }
 0x115   :  { %v187_v50 = vld [vmem:[#allocation6 + $0x3f0] sm:$0xff] }
 0x116   :  { %v3178_v0 = vcombine.low %v183_v49, %v187_v50 }
 0x117   :  { %2680 = vmatpush1.bf16.msra.mxu0 %v3114_v56  ;;  %2803 = vmatpush1.bf16.msra.mxu1 %v3116_v57  ;;  %v3179_v56 = vcombine.high %v183_v49, %v187_v50  ;;  %v3181_v57 = vcombine.high %v184_v51, %v188_v52 }
 0x118   :  { %2681 = vmatprep.subr.bf16.mxu0 %v3123_v58  ;;  %2804 = vmatprep.subr.bf16.mxu1 %v3125_v60  ;;  %v191_v58 = vld [vmem:[#allocation6 + $0x410] sm:$0xff] }
 0x119   :  { %v195_v60 = vld [vmem:[#allocation6 + $0x430] sm:$0xff] }
 0x11a   :  { %v3186_v8 = vcombine.low %v191_v58, %v195_v60 }
 0x11b   :  { %2682 = vmatpush1.bf16.msra.mxu0 %v3122_v2  ;;  %2805 = vmatpush1.bf16.msra.mxu1 %v3124_v3  ;;  %v3187_v2 = vcombine.high %v191_v58, %v195_v60  ;;  %v3189_v3 = vcombine.high %v192_v61, %v196_v62 }
 0x11c   :  { %2683 = vmatprep.subr.bf16.mxu0 %v3131_v4  ;;  %2806 = vmatprep.subr.bf16.mxu1 %v3133_v5  ;;  %v199_v4 = vld [vmem:[#allocation6 + $0x450] sm:$0xff] }
 0x11d   :  { %v203_v5 = vld [vmem:[#allocation6 + $0x470] sm:$0xff] }
 0x11e   :  { %v3194_v17 = vcombine.low %v199_v4, %v203_v5 }
 0x11f   :  { %2684 = vmatpush1.bf16.msra.mxu0 %v3130_v11  ;;  %2807 = vmatpush1.bf16.msra.mxu1 %v3132_v12  ;;  %v3195_v11 = vcombine.high %v199_v4, %v203_v5  ;;  %v3197_v12 = vcombine.high %v200_v6, %v204_v7 }
 0x120   :  { %2685 = vmatprep.subr.bf16.mxu0 %v3139_v13  ;;  %2808 = vmatprep.subr.bf16.mxu1 %v3141_v14  ;;  %v207_v13 = vld [vmem:[#allocation6 + $0x490] sm:$0xff] }
 0x121   :  { %v211_v14 = vld [vmem:[#allocation6 + $0x4b0] sm:$0xff] }
 0x122   :  { %v3202_v24 = vcombine.low %v207_v13, %v211_v14 }
 0x123   :  { %2686 = vmatpush1.bf16.msra.mxu0 %v3138_v19  ;;  %2809 = vmatpush1.bf16.msra.mxu1 %v3140_v20  ;;  %v3203_v19 = vcombine.high %v207_v13, %v211_v14  ;;  %v3205_v20 = vcombine.high %v208_v15, %v212_v16 }
 0x124   :  { %2687 = vmatprep.subr.bf16.mxu0 %v3147_v21  ;;  %2810 = vmatprep.subr.bf16.mxu1 %v3149_v22  ;;  %v215_v21 = vld [vmem:[#allocation6 + $0x4d0] sm:$0xff] }
 0x125   :  { %v219_v22 = vld [vmem:[#allocation6 + $0x4f0] sm:$0xff] }
 0x126   :  { %v3211_v26 = vcombine.high %v215_v21, %v219_v22  ;;  %v3210_v32 = vcombine.low %v215_v21, %v219_v22 }
 0x127   :  { %2688 = vmatpush1.bf16.msra.mxu0 %v3146_v27  ;;  %2811 = vmatpush1.bf16.msra.mxu1 %v3148_v28  ;;  %v3213_v27 = vcombine.high %v216_v23, %v220_v9  ;;  %v223_v28 = vld [vmem:[#allocation6 + $0x510] sm:$0xff] }
 0x128   :  { %2689 = vmatprep.subr.bf16.mxu0 %v3155_v29  ;;  %2812 = vmatprep.subr.bf16.mxu1 %v3157_v59  ;;  %v227_v29 = vld [vmem:[#allocation6 + $0x530] sm:$0xff]  ;;  %v224_v59 = vld [vmem:[#allocation6 + $0x518] sm:$0xff] }
 0x129   :  { %v3219_v34 = vcombine.high %v223_v28, %v227_v29  ;;  %v3218_v41 = vcombine.low %v223_v28, %v227_v29  ;;  %v3220_v42 = vcombine.low %v224_v59, %v228_v30 }
 0x12b   :  { %2690 = vmatpush1.bf16.msra.mxu0 %v3154_v36  ;;  %2813 = vmatpush1.bf16.msra.mxu1 %v3156_v37  ;;  %v231_v36 = vld [vmem:[#allocation6 + $0x550] sm:$0xff] }
 0x12c   :  { %2691 = vmatprep.subr.bf16.mxu0 %v3163_v38  ;;  %2814 = vmatprep.subr.bf16.mxu1 %v3165_v39  ;;  %v235_v37 = vld [vmem:[#allocation6 + $0x570] sm:$0xff]  ;;  %v232_v38 = vld [vmem:[#allocation6 + $0x558] sm:$0xff] }
 0x12d   :  { %v236_v39 = vld [vmem:[#allocation6 + $0x578] sm:$0xff]  ;;  %v3227_v43 = vcombine.high %v231_v36, %v235_v37  ;;  %v3226_v49 = vcombine.low %v231_v36, %v235_v37 }
 0x12e   :  { %v3229_v53 = vcombine.high %v232_v38, %v236_v39  ;;  %v3228_v50 = vcombine.low %v232_v38, %v236_v39 }
 0x12f   :  { %2692 = vmatpush1.bf16.msra.mxu0 %v3162_v45  ;;  %2815 = vmatpush1.bf16.msra.mxu1 %v3164_v46  ;;  %v239_v45 = vld [vmem:[#allocation6 + $0x590] sm:$0xff] }
 0x130   :  { %2693 = vmatprep.subr.bf16.mxu0 %v3171_v47  ;;  %2816 = vmatprep.subr.bf16.mxu1 %v3173_v48  ;;  %v243_v46 = vld [vmem:[#allocation6 + $0x5b0] sm:$0xff]  ;;  %v240_v47 = vld [vmem:[#allocation6 + $0x598] sm:$0xff] }
 0x131   :  { %v244_v48 = vld [vmem:[#allocation6 + $0x5b8] sm:$0xff]  ;;  %v3235_v51 = vcombine.high %v239_v45, %v243_v46  ;;  %v3234_v58 = vcombine.low %v239_v45, %v243_v46 }
 0x132   :  { %v3237_v52 = vcombine.high %v240_v47, %v244_v48  ;;  %v3236_v60 = vcombine.low %v240_v47, %v244_v48 }
 0x133   :  { %2694 = vmatpush1.bf16.msra.mxu0 %v3170_v54  ;;  %2817 = vmatpush1.bf16.msra.mxu1 %v3172_v55  ;;  %v247_v54 = vld [vmem:[#allocation6 + $0x5d0] sm:$0xff] }
 0x134   :  { %2695 = vmatprep.subr.bf16.mxu0 %v3179_v56  ;;  %2818 = vmatprep.subr.bf16.mxu1 %v3181_v57  ;;  %v251_v55 = vld [vmem:[#allocation6 + $0x5f0] sm:$0xff]  ;;  %v248_v56 = vld [vmem:[#allocation6 + $0x5d8] sm:$0xff] }
 0x135   :  { %v252_v57 = vld [vmem:[#allocation6 + $0x5f8] sm:$0xff]  ;;  %v3243_v61 = vcombine.high %v247_v54, %v251_v55  ;;  %v3242_v4 = vcombine.low %v247_v54, %v251_v55 }
 0x136   :  { %v3245_v62 = vcombine.high %v248_v56, %v252_v57  ;;  %v3244_v5 = vcombine.low %v248_v56, %v252_v57 }
 0x137   :  { %2696 = vmatpush1.bf16.msra.mxu0 %v3178_v0  ;;  %2819 = vmatpush1.bf16.msra.mxu1 %v3180_v1  ;;  %v255_v0 = vld [vmem:[#allocation6 + $0x610] sm:$0xff] }
 0x138   :  { %2706 = vmatprep.subr.bf16.mxu0 %v3187_v2  ;;  %2829 = vmatprep.subr.bf16.mxu1 %v3189_v3  ;;  %v259_v1 = vld [vmem:[#allocation6 + $0x630] sm:$0xff]  ;;  %v256_v2 = vld [vmem:[#allocation6 + $0x618] sm:$0xff] }
 0x139   :  { %v260_v3 = vld [vmem:[#allocation6 + $0x638] sm:$0xff]  ;;  %v3251_v6 = vcombine.high %v255_v0, %v259_v1  ;;  %v3250_v13 = vcombine.low %v255_v0, %v259_v1 }
 0x13a   :  { %2698 = vmatmul.mubr.bf16.vlgmr.msra.gmra.mrb[4].mxu0 %v3660_v25  ;;  %2821 = vmatmul.mubr.bf16.vlgmr.msra.gmra.mrb[4].mxu1 %v3660_v25  ;;  %v3204_v25 = vcombine.low %v208_v15, %v212_v16  ;;  %v3253_v7 = vcombine.high %v256_v2, %v260_v3  ;;  %v3252_v14 = vcombine.low %v256_v2, %v260_v3 }
 0x13b   :  { %2707 = vmatpush1.bf16.msra.mxu0 %v3186_v8  ;;  %2830 = vmatpush1.bf16.msra.mxu1 %v3188_v10  ;;  %v263_v8 = vld [vmem:[#allocation6 + $0x650] sm:$0xff] }
 0x13c   :  { %2708 = vmatprep.subr.bf16.mxu0 %v3195_v11  ;;  %2831 = vmatprep.subr.bf16.mxu1 %v3197_v12  ;;  %v267_v10 = vld [vmem:[#allocation6 + $0x670] sm:$0xff]  ;;  %v264_v11 = vld [vmem:[#allocation6 + $0x658] sm:$0xff] }
 0x13d   :  { %2738 = vmatprep.mubr.bf16.mxu0 %v3667_v63  ;;  %2861 = vmatprep.mubr.bf16.mxu1 %v3667_v63  ;;  %v3221_v63 = vcombine.high %v224_v59, %v228_v30  ;;  %v268_v12 = vld [vmem:[#allocation6 + $0x678] sm:$0xff]  ;;  %v3259_v15 = vcombine.high %v263_v8, %v267_v10  ;;  %v3258_v21 = vcombine.low %v263_v8, %v267_v10 }
 0x13e   :  { %v3261_v16 = vcombine.high %v264_v11, %v268_v12  ;;  %v3260_v22 = vcombine.low %v264_v11, %v268_v12 }
 0x13f   :  { %2709 = vmatpush1.bf16.msra.mxu0 %v3194_v17  ;;  %2832 = vmatpush1.bf16.msra.mxu1 %v3196_v18  ;;  %v271_v17 = vld [vmem:[#allocation6 + $0x690] sm:$0xff] }
 0x140   :  { %2710 = vmatprep.subr.bf16.mxu0 %v3203_v19  ;;  %2833 = vmatprep.subr.bf16.mxu1 %v3205_v20  ;;  %v275_v18 = vld [vmem:[#allocation6 + $0x6b0] sm:$0xff]  ;;  %v272_v19 = vld [vmem:[#allocation6 + $0x698] sm:$0xff] }
 0x141   :  { %v276_v20 = vld [vmem:[#allocation6 + $0x6b8] sm:$0xff]  ;;  %v3267_v23 = vcombine.high %v271_v17, %v275_v18  ;;  %v3266_v28 = vcombine.low %v271_v17, %v275_v18 }
 0x142   :  { %v3269_v9 = vcombine.high %v272_v19, %v276_v20  ;;  %v3268_v29 = vcombine.low %v272_v19, %v276_v20 }
 0x143   :  { %2711 = vmatpush1.bf16.msra.mxu0 %v3202_v24  ;;  %2834 = vmatpush1.bf16.msra.mxu1 %v3204_v25  ;;  %v279_v24 = vld [vmem:[#allocation6 + $0x6d0] sm:$0xff] }
 0x144   :  { %2712 = vmatprep.subr.bf16.mxu0 %v3211_v26  ;;  %2835 = vmatprep.subr.bf16.mxu1 %v3213_v27  ;;  %v283_v25 = vld [vmem:[#allocation6 + $0x6f0] sm:$0xff]  ;;  %v280_v26 = vld [vmem:[#allocation6 + $0x6d8] sm:$0xff] }
 0x145   :  { %v284_v27 = vld [vmem:[#allocation6 + $0x6f8] sm:$0xff]  ;;  %v3275_v59 = vcombine.high %v279_v24, %v283_v25  ;;  %v3274_v36 = vcombine.low %v279_v24, %v283_v25 }
 0x146   :  { %v3277_v30 = vcombine.high %v280_v26, %v284_v27  ;;  %v3276_v37 = vcombine.low %v280_v26, %v284_v27 }
 0x147   :  { %2713 = vmatpush1.bf16.msra.mxu0 %v3210_v32  ;;  %2836 = vmatpush1.bf16.msra.mxu1 %v3212_v33  ;;  %v287_v32 = vld [vmem:[#allocation6 + $0x710] sm:$0xff] }
 0x148   :  { %2714 = vmatprep.subr.bf16.mxu0 %v3219_v34  ;;  %2837 = vmatprep.subr.bf16.mxu1 %v3221_v63  ;;  %v291_v33 = vld [vmem:[#allocation6 + $0x730] sm:$0xff]  ;;  %v288_v34 = vld [vmem:[#allocation6 + $0x718] sm:$0xff] }
 0x149   :  { %v292_v63 = vld [vmem:[#allocation6 + $0x738] sm:$0xff]  ;;  %v3283_v38 = vcombine.high %v287_v32, %v291_v33  ;;  %v3282_v45 = vcombine.low %v287_v32, %v291_v33 }
 0x14a   :  { %v3285_v39 = vcombine.high %v288_v34, %v292_v63  ;;  %v3284_v46 = vcombine.low %v288_v34, %v292_v63  ;;  %v351_v63 = vld [vmem:[#allocation6 + $0x910] sm:$0xff] }
 0x14b   :  { %2715 = vmatpush1.bf16.msra.mxu0 %v3218_v41  ;;  %2838 = vmatpush1.bf16.msra.mxu1 %v3220_v42  ;;  %v295_v41 = vld [vmem:[#allocation6 + $0x750] sm:$0xff] }
 0x14c   :  { %2716 = vmatprep.subr.bf16.mxu0 %v3227_v43  ;;  %2839 = vmatprep.subr.bf16.mxu1 %v3229_v53  ;;  %v299_v42 = vld [vmem:[#allocation6 + $0x770] sm:$0xff]  ;;  %v296_v43 = vld [vmem:[#allocation6 + $0x758] sm:$0xff] }
 0x14d   :  { %v300_v53 = vld [vmem:[#allocation6 + $0x778] sm:$0xff]  ;;  %v3291_v47 = vcombine.high %v295_v41, %v299_v42  ;;  %v3290_v54 = vcombine.low %v295_v41, %v299_v42 }
 0x14e   :  { %v3293_v48 = vcombine.high %v296_v43, %v300_v53  ;;  %v3292_v55 = vcombine.low %v296_v43, %v300_v53  ;;  %v359_v43 = vld [vmem:[#allocation6 + $0x950] sm:$0xff] }
 0x14f   :  { %2717 = vmatpush1.bf16.msra.mxu0 %v3226_v49  ;;  %2840 = vmatpush1.bf16.msra.mxu1 %v3228_v50  ;;  %v303_v49 = vld [vmem:[#allocation6 + $0x790] sm:$0xff] }
 0x150   :  { %2718 = vmatprep.subr.bf16.mxu0 %v3235_v51  ;;  %2841 = vmatprep.subr.bf16.mxu1 %v3237_v52  ;;  %v307_v50 = vld [vmem:[#allocation6 + $0x7b0] sm:$0xff]  ;;  %v304_v51 = vld [vmem:[#allocation6 + $0x798] sm:$0xff] }
 0x151   :  { %v308_v52 = vld [vmem:[#allocation6 + $0x7b8] sm:$0xff]  ;;  %v3299_v56 = vcombine.high %v303_v49, %v307_v50  ;;  %v3298_v0 = vcombine.low %v303_v49, %v307_v50  ;;  %v363_v53 = vld [vmem:[#allocation6 + $0x970] sm:$0xff] }
 0x152   :  { %v3301_v57 = vcombine.high %v304_v51, %v308_v52  ;;  %v3300_v1 = vcombine.low %v304_v51, %v308_v52  ;;  %v3355_v49 = vcombine.high %v359_v43, %v363_v53  ;;  %v367_v51 = vld [vmem:[#allocation6 + $0x990] sm:$0xff] }
 0x153   :  { %2719 = vmatpush1.bf16.msra.mxu0 %v3234_v58  ;;  %2842 = vmatpush1.bf16.msra.mxu1 %v3236_v60  ;;  %v311_v58 = vld [vmem:[#allocation6 + $0x7d0] sm:$0xff] }
 0x154   :  { %2720 = vmatprep.subr.bf16.mxu0 %v3243_v61  ;;  %2843 = vmatprep.subr.bf16.mxu1 %v3245_v62  ;;  %v315_v60 = vld [vmem:[#allocation6 + $0x7f0] sm:$0xff]  ;;  %v312_v61 = vld [vmem:[#allocation6 + $0x7d8] sm:$0xff] }
 0x155   :  { %v316_v62 = vld [vmem:[#allocation6 + $0x7f8] sm:$0xff]  ;;  %v3307_v2 = vcombine.high %v311_v58, %v315_v60  ;;  %v3306_v8 = vcombine.low %v311_v58, %v315_v60  ;;  %v371_v52 = vld [vmem:[#allocation6 + $0x9b0] sm:$0xff] }
 0x156   :  { %v3309_v3 = vcombine.high %v312_v61, %v316_v62  ;;  %v3308_v10 = vcombine.low %v312_v61, %v316_v62  ;;  %v3363_v58 = vcombine.high %v367_v51, %v371_v52  ;;  %v375_v61 = vld [vmem:[#allocation6 + $0x9d0] sm:$0xff] }
 0x157   :  { %2721 = vmatpush1.bf16.msra.mxu0 %v3242_v4  ;;  %2844 = vmatpush1.bf16.msra.mxu1 %v3244_v5  ;;  %v319_v4 = vld [vmem:[#allocation6 + $0x810] sm:$0xff] }
 0x158   :  { %2722 = vmatprep.subr.bf16.mxu0 %v3251_v6  ;;  %2845 = vmatprep.subr.bf16.mxu1 %v3253_v7  ;;  %v323_v5 = vld [vmem:[#allocation6 + $0x830] sm:$0xff]  ;;  %v320_v6 = vld [vmem:[#allocation6 + $0x818] sm:$0xff] }
 0x159   :  { %v324_v7 = vld [vmem:[#allocation6 + $0x838] sm:$0xff]  ;;  %v3315_v11 = vcombine.high %v319_v4, %v323_v5  ;;  %v3314_v17 = vcombine.low %v319_v4, %v323_v5  ;;  %v379_v62 = vld [vmem:[#allocation6 + $0x9f0] sm:$0xff] }
 0x15a   :  { %v3317_v12 = vcombine.high %v320_v6, %v324_v7  ;;  %v3316_v18 = vcombine.low %v320_v6, %v324_v7  ;;  %v3371_v4 = vcombine.high %v375_v61, %v379_v62  ;;  %v383_v6 = vld [vmem:[#allocation6 + $0xa10] sm:$0xff] }
 0x15b   :  { %2723 = vmatpush1.bf16.msra.mxu0 %v3250_v13  ;;  %2846 = vmatpush1.bf16.msra.mxu1 %v3252_v14  ;;  %v327_v13 = vld [vmem:[#allocation6 + $0x850] sm:$0xff] }
 0x15c   :  { %2724 = vmatprep.subr.bf16.mxu0 %v3259_v15  ;;  %2847 = vmatprep.subr.bf16.mxu1 %v3261_v16  ;;  %v331_v14 = vld [vmem:[#allocation6 + $0x870] sm:$0xff]  ;;  %v328_v15 = vld [vmem:[#allocation6 + $0x858] sm:$0xff] }
 0x15d   :  { %v332_v16 = vld [vmem:[#allocation6 + $0x878] sm:$0xff]  ;;  %v3323_v19 = vcombine.high %v327_v13, %v331_v14  ;;  %v3322_v24 = vcombine.low %v327_v13, %v331_v14  ;;  %v387_v7 = vld [vmem:[#allocation6 + $0xa30] sm:$0xff] }
 0x15e   :  { %v3325_v20 = vcombine.high %v328_v15, %v332_v16  ;;  %v3324_v25 = vcombine.low %v328_v15, %v332_v16  ;;  %v3379_v13 = vcombine.high %v383_v6, %v387_v7  ;;  %v391_v15 = vld [vmem:[#allocation6 + $0xa50] sm:$0xff] }
 0x15f   :  { %2725 = vmatpush1.bf16.msra.mxu0 %v3258_v21  ;;  %2848 = vmatpush1.bf16.msra.mxu1 %v3260_v22  ;;  %v335_v21 = vld [vmem:[#allocation6 + $0x890] sm:$0xff] }
 0x160   :  { %2726 = vmatprep.subr.bf16.mxu0 %v3267_v23  ;;  %2849 = vmatprep.subr.bf16.mxu1 %v3269_v9  ;;  %v339_v22 = vld [vmem:[#allocation6 + $0x8b0] sm:$0xff]  ;;  %v336_v23 = vld [vmem:[#allocation6 + $0x898] sm:$0xff] }
 0x161   :  { %v340_v9 = vld [vmem:[#allocation6 + $0x8b8] sm:$0xff]  ;;  %v3331_v26 = vcombine.high %v335_v21, %v339_v22  ;;  %v3330_v32 = vcombine.low %v335_v21, %v339_v22  ;;  %v395_v16 = vld [vmem:[#allocation6 + $0xa70] sm:$0xff] }
 0x162   :  { %v3333_v27 = vcombine.high %v336_v23, %v340_v9  ;;  %v3387_v21 = vcombine.high %v391_v15, %v395_v16 }
 0x163   :  { %2727 = vmatpush1.bf16.msra.mxu0 %v3266_v28  ;;  %2850 = vmatpush1.bf16.msra.mxu1 %v3268_v29  ;;  %v343_v28 = vld [vmem:[#allocation6 + $0x8d0] sm:$0xff] }
 0x164   :  { %2728 = vmatprep.subr.bf16.mxu0 %v3275_v59  ;;  %2851 = vmatprep.subr.bf16.mxu1 %v3277_v30  ;;  %v347_v29 = vld [vmem:[#allocation6 + $0x8f0] sm:$0xff]  ;;  %v344_v59 = vld [vmem:[#allocation6 + $0x8d8] sm:$0xff] }
 0x165   :  { %v348_v30 = vld [vmem:[#allocation6 + $0x8f8] sm:$0xff]  ;;  %v3339_v33 = vcombine.high %v343_v28, %v347_v29 }
 0x166   :  { %v3341_v34 = vcombine.high %v344_v59, %v348_v30  ;;  %v3340_v41 = vcombine.low %v344_v59, %v348_v30  ;;  %v407_v59 = vld [vmem:[#allocation6 + $0xad0] sm:$0xff] }
 0x167   :  { %2729 = vmatpush1.bf16.msra.mxu0 %v3274_v36  ;;  %2852 = vmatpush1.bf16.msra.mxu1 %v3276_v37  ;;  %v355_v36 = vld [vmem:[#allocation6 + $0x930] sm:$0xff]  ;;  %v352_v37 = vld [vmem:[#allocation6 + $0x918] sm:$0xff] }
 0x168   :  { %2730 = vmatprep.subr.bf16.mxu0 %v3283_v38  ;;  %2853 = vmatprep.subr.bf16.mxu1 %v3285_v39  ;;  %v356_v38 = vld [vmem:[#allocation6 + $0x938] sm:$0xff]  ;;  %v3338_v39 = vcombine.low %v343_v28, %v347_v29  ;;  %v3347_v42 = vcombine.high %v351_v63, %v355_v36  ;;  %v411_v30 = vld [vmem:[#allocation6 + $0xaf0] sm:$0xff] }
 0x16b   :  { %2731 = vmatpush1.bf16.msra.mxu0 %v3282_v45  ;;  %2854 = vmatpush1.bf16.msra.mxu1 %v3284_v46  ;;  %v360_v45 = vld [vmem:[#allocation6 + $0x958] sm:$0xff] }
 0x16c   :  { %2732 = vmatprep.subr.bf16.mxu0 %v3291_v47  ;;  %2855 = vmatprep.subr.bf16.mxu1 %v3293_v48  ;;  %v364_v46 = vld [vmem:[#allocation6 + $0x978] sm:$0xff]  ;;  %v3346_v47 = vcombine.low %v351_v63, %v355_v36  ;;  %v3348_v48 = vcombine.low %v352_v37, %v356_v38  ;;  %v3403_v63 = vcombine.high %v407_v59, %v411_v30 }
 0x16d   :  { %v3357_v50 = vcombine.high %v360_v45, %v364_v46 }
 0x16f   :  { %2733 = vmatpush1.bf16.msra.mxu0 %v3290_v54  ;;  %2856 = vmatpush1.bf16.msra.mxu1 %v3292_v55  ;;  %v368_v54 = vld [vmem:[#allocation6 + $0x998] sm:$0xff] }
 0x170   :  { %2734 = vmatprep.subr.bf16.mxu0 %v3299_v56  ;;  %2857 = vmatprep.subr.bf16.mxu1 %v3301_v57  ;;  %v372_v55 = vld [vmem:[#allocation6 + $0x9b8] sm:$0xff]  ;;  %v3354_v56 = vcombine.low %v359_v43, %v363_v53  ;;  %v3356_v57 = vcombine.low %v360_v45, %v364_v46  ;;  %v423_v45 = vld [vmem:[#allocation6 + $0xb50] sm:$0xff] }
 0x171   :  { %v3365_v60 = vcombine.high %v368_v54, %v372_v55  ;;  %v427_v46 = vld [vmem:[#allocation6 + $0xb70] sm:$0xff] }
 0x173   :  { %2735 = vmatpush1.bf16.msra.mxu0 %v3298_v0  ;;  %2858 = vmatpush1.bf16.msra.mxu1 %v3300_v1  ;;  %v376_v0 = vld [vmem:[#allocation6 + $0x9d8] sm:$0xff] }
 0x174   :  { %2736 = vmatprep.subr.bf16.mxu0 %v3307_v2  ;;  %2859 = vmatprep.subr.bf16.mxu1 %v3309_v3  ;;  %v380_v1 = vld [vmem:[#allocation6 + $0x9f8] sm:$0xff]  ;;  %v3362_v2 = vcombine.low %v367_v51, %v371_v52  ;;  %v3364_v3 = vcombine.low %v368_v54, %v372_v55  ;;  %v3419_v51 = vcombine.high %v423_v45, %v427_v46  ;;  %v431_v54 = vld [vmem:[#allocation6 + $0xb90] sm:$0xff] }
 0x175   :  { %v3373_v5 = vcombine.high %v376_v0, %v380_v1  ;;  %v435_v55 = vld [vmem:[#allocation6 + $0xbb0] sm:$0xff] }
 0x177   :  { %2737 = vmatpush1.bf16.msra.mxu0 %v3306_v8  ;;  %2860 = vmatpush1.bf16.msra.mxu1 %v3308_v10  ;;  %v384_v8 = vld [vmem:[#allocation6 + $0xa18] sm:$0xff] }
 0x178   :  { %2747 = vmatprep.subr.bf16.mxu0 %v3315_v11  ;;  %2870 = vmatprep.subr.bf16.mxu1 %v3317_v12  ;;  %v388_v10 = vld [vmem:[#allocation6 + $0xa38] sm:$0xff]  ;;  %v3370_v11 = vcombine.low %v375_v61, %v379_v62  ;;  %v3372_v12 = vcombine.low %v376_v0, %v380_v1  ;;  %v3427_v61 = vcombine.high %v431_v54, %v435_v55  ;;  %v439_v0 = vld [vmem:[#allocation6 + $0xbd0] sm:$0xff] }
 0x179   :  { %v3381_v14 = vcombine.high %v384_v8, %v388_v10  ;;  %v443_v1 = vld [vmem:[#allocation6 + $0xbf0] sm:$0xff] }
 0x17a   :  { %2739 = vmatmul.mubr.bf16.vlgmr.msra.gmra.mrb[4].mxu0 %v3678_v40  ;;  %2862 = vmatmul.mubr.bf16.vlgmr.msra.gmra.mrb[4].mxu1 %v3678_v40  ;;  %v3332_v40 = vcombine.low %v336_v23, %v340_v9  ;;  %v399_v23 = vld [vmem:[#allocation6 + $0xa90] sm:$0xff] }
 0x17b   :  { %2748 = vmatpush1.bf16.msra.mxu0 %v3314_v17  ;;  %2871 = vmatpush1.bf16.msra.mxu1 %v3316_v18  ;;  %v392_v17 = vld [vmem:[#allocation6 + $0xa58] sm:$0xff]  ;;  %v403_v9 = vld [vmem:[#allocation6 + $0xab0] sm:$0xff] }
 0x17c   :  { %2749 = vmatprep.subr.bf16.mxu0 %v3323_v19  ;;  %2872 = vmatprep.subr.bf16.mxu1 %v3325_v20  ;;  %v396_v18 = vld [vmem:[#allocation6 + $0xa78] sm:$0xff]  ;;  %v3378_v19 = vcombine.low %v383_v6, %v387_v7  ;;  %v3380_v20 = vcombine.low %v384_v8, %v388_v10  ;;  %v3395_v28 = vcombine.high %v399_v23, %v403_v9 }
 0x17d   :  { %2779 = vmatprep.mubr.bf16.mxu0 %v3670_v35  ;;  %2902 = vmatprep.mubr.bf16.mxu1 %v3670_v35  ;;  %v3349_v35 = vcombine.high %v352_v37, %v356_v38  ;;  %v3389_v22 = vcombine.high %v392_v17, %v396_v18  ;;  %v415_v37 = vld [vmem:[#allocation6 + $0xb10] sm:$0xff]  ;;  %v3435_v6 = vcombine.high %v439_v0, %v443_v1 }
 0x17e   :  { %v419_v38 = vld [vmem:[#allocation6 + $0xb30] sm:$0xff]  ;;  %v3434_v8 = vcombine.low %v439_v0, %v443_v1 }
 0x17f   :  { %2750 = vmatpush1.bf16.msra.mxu0 %v3322_v24  ;;  %2873 = vmatpush1.bf16.msra.mxu1 %v3324_v25  ;;  %v400_v24 = vld [vmem:[#allocation6 + $0xa98] sm:$0xff]  ;;  %v3411_v43 = vcombine.high %v415_v37, %v419_v38 }
 0x180   :  { %2751 = vmatprep.subr.bf16.mxu0 %v3331_v26  ;;  %2874 = vmatprep.subr.bf16.mxu1 %v3333_v27  ;;  %v404_v25 = vld [vmem:[#allocation6 + $0xab8] sm:$0xff]  ;;  %v3386_v26 = vcombine.low %v391_v15, %v395_v16  ;;  %v3388_v27 = vcombine.low %v392_v17, %v396_v18  ;;  %v2976_v15 = vsub.s32 2, %v3637_v44  ;;  %v2980_v16 = vsub.s32 3, %v3637_v44  ;;  %v2964_v17 = vld [vmem:[#allocation8] sm:$0xff] }
 0x181   :  { %v3397_v29 = vcombine.high %v400_v24, %v404_v25 }
 0x183   :  { %2752 = vmatpush1.bf16.msra.mxu0 %v3330_v32  ;;  %2875 = vmatpush1.bf16.msra.mxu1 %v3332_v40  ;;  %v408_v32 = vld [vmem:[#allocation6 + $0xad8] sm:$0xff] }
 0x184   :  { %2753 = vmatprep.subr.bf16.mxu0 %v3339_v33  ;;  %2876 = vmatprep.subr.bf16.mxu1 %v3341_v34  ;;  %v412_v40 = vld [vmem:[#allocation6 + $0xaf8] sm:$0xff]  ;;  %v3394_v33 = vcombine.low %v399_v23, %v403_v9  ;;  %v3396_v34 = vcombine.low %v400_v24, %v404_v25 }
 0x185   :  { %v3405_v36 = vcombine.high %v408_v32, %v412_v40 }
 0x187   :  { %2754 = vmatpush1.bf16.msra.mxu0 %v3338_v39  ;;  %2877 = vmatpush1.bf16.msra.mxu1 %v3340_v41  ;;  %v416_v39 = vld [vmem:[#allocation6 + $0xb18] sm:$0xff] }
 0x188   :  { %2755 = vmatprep.subr.bf16.mxu0 %v3347_v42  ;;  %2878 = vmatprep.subr.bf16.mxu1 %v3349_v35  ;;  %v420_v41 = vld [vmem:[#allocation6 + $0xb38] sm:$0xff]  ;;  %v3402_v42 = vcombine.low %v407_v59, %v411_v30  ;;  %v3404_v35 = vcombine.low %v408_v32, %v412_v40 }
 0x189   :  { %v3413_v53 = vcombine.high %v416_v39, %v420_v41 }
 0x18b   :  { %2756 = vmatpush1.bf16.msra.mxu0 %v3346_v47  ;;  %2879 = vmatpush1.bf16.msra.mxu1 %v3348_v48  ;;  %v424_v47 = vld [vmem:[#allocation6 + $0xb58] sm:$0xff] }
 0x18c   :  { %2757 = vmatprep.subr.bf16.mxu0 %v3355_v49  ;;  %2880 = vmatprep.subr.bf16.mxu1 %v3357_v50  ;;  %v428_v48 = vld [vmem:[#allocation6 + $0xb78] sm:$0xff]  ;;  %v3410_v49 = vcombine.low %v415_v37, %v419_v38  ;;  %v3412_v50 = vcombine.low %v416_v39, %v420_v41  ;;  %v2984_v41 = vsub.s32 4, %v3637_v44 }
 0x18d   :  { %v3421_v52 = vcombine.high %v424_v47, %v428_v48 }
 0x18f   :  { %2758 = vmatpush1.bf16.msra.mxu0 %v3354_v56  ;;  %2881 = vmatpush1.bf16.msra.mxu1 %v3356_v57  ;;  %v432_v56 = vld [vmem:[#allocation6 + $0xb98] sm:$0xff] }
 0x190   :  { %2759 = vmatprep.subr.bf16.mxu0 %v3363_v58  ;;  %2882 = vmatprep.subr.bf16.mxu1 %v3365_v60  ;;  %v436_v57 = vld [vmem:[#allocation6 + $0xbb8] sm:$0xff]  ;;  %v3418_v58 = vcombine.low %v423_v45, %v427_v46  ;;  %v3420_v60 = vcombine.low %v424_v47, %v428_v48 }
 0x191   :  { %v3429_v62 = vcombine.high %v432_v56, %v436_v57 }
 0x193   :  { %2760 = vmatpush1.bf16.msra.mxu0 %v3362_v2  ;;  %2883 = vmatpush1.bf16.msra.mxu1 %v3364_v3  ;;  %v440_v2 = vld [vmem:[#allocation6 + $0xbd8] sm:$0xff] }
 0x194   :  { %2761 = vmatprep.subr.bf16.mxu0 %v3371_v4  ;;  %2884 = vmatprep.subr.bf16.mxu1 %v3373_v5  ;;  %v444_v3 = vld [vmem:[#allocation6 + $0xbf8] sm:$0xff]  ;;  %v3426_v4 = vcombine.low %v431_v54, %v435_v55  ;;  %v3428_v5 = vcombine.low %v432_v56, %v436_v57 }
 0x195   :  { %v3437_v7 = vcombine.high %v440_v2, %v444_v3  ;;  %v3436_v10 = vcombine.low %v440_v2, %v444_v3 }
 0x197   :  { %2762 = vmatpush1.bf16.msra.mxu0 %v3370_v11  ;;  %2885 = vmatpush1.bf16.msra.mxu1 %v3372_v12  ;;  %v3579_v11 = vmov 1983009808  }
 0x198   :  { %2763 = vmatprep.subr.bf16.mxu0 %v3379_v13  ;;  %2886 = vmatprep.subr.bf16.mxu1 %v3381_v14  ;;  %v2922_v12 = vunpack.c.l.s4 %v3579_v11  ;;  %v2968_v13 = vsub.s32 0, %v3637_v44  ;;  %v2972_v14 = vsub.s32 1, %v3637_v44 }
 0x19a   :  { %v2923_v18 = vunpack.c.0.s8 %v2922_v12 }
 0x19b   :  { %2764 = vmatpush1.bf16.msra.mxu0 %v3378_v19  ;;  %2887 = vmatpush1.bf16.msra.mxu1 %v3380_v20  ;;  %v2969_v19 = vrot.slane %v2964_v17, %v2968_v13  ;;  %v2973_v20 = vrot.slane %v2964_v17, %v2972_v14 }
 0x19c   :  { %2765 = vmatprep.subr.bf16.mxu0 %v3387_v21  ;;  %2888 = vmatprep.subr.bf16.mxu1 %v3389_v22  ;;  %v2977_v21 = vrot.slane %v2964_v17, %v2976_v15  ;;  %v2981_v22 = vrot.slane %v2964_v17, %v2980_v16  ;;  %v2926_v23 = vsub.s32 %v2923_v18, %v3637_v44 }
 0x19d   :  { %v2998_v9 = vcombine.low %v2969_v19, %v2973_v20 }
 0x19f   :  { %2766 = vmatpush1.bf16.msra.mxu0 %v3386_v26  ;;  %2889 = vmatpush1.bf16.msra.mxu1 %v3388_v27  ;;  %v3006_v27 = vrot.slane %v2998_v9, %v2926_v23 }
 0x1a0   :  { %2767 = vmatprep.subr.bf16.mxu0 %v3395_v28  ;;  %2890 = vmatprep.subr.bf16.mxu1 %v3397_v29 }
 0x1a3   :  { %2768 = vmatpush1.bf16.msra.mxu0 %v3394_v33  ;;  %2891 = vmatpush1.bf16.msra.mxu1 %v3396_v34 }
 0x1a4   :  { %2769 = vmatprep.subr.bf16.mxu0 %v3403_v63  ;;  %2892 = vmatprep.subr.bf16.mxu1 %v3405_v36 }
 0x1a7   :  { %2770 = vmatpush1.bf16.msra.mxu0 %v3402_v42  ;;  %2893 = vmatpush1.bf16.msra.mxu1 %v3404_v35  ;;  %v2988_v42 = vsub.s32 5, %v3637_v44  ;;  %v2992_v35 = vsub.s32 6, %v3637_v44 }
 0x1a8   :  { %2771 = vmatprep.subr.bf16.mxu0 %v3411_v43  ;;  %2894 = vmatprep.subr.bf16.mxu1 %v3413_v53  ;;  %v2996_v43 = vsub.s32 7, %v3637_v44  ;;  %v2985_v53 = vrot.slane %v2964_v17, %v2984_v41 }
 0x1a9   :  { %v2989_v45 = vrot.slane %v2964_v17, %v2988_v42  ;;  %v2993_v46 = vrot.slane %v2964_v17, %v2992_v35 }
 0x1aa   :  { %v2997_v47 = vrot.slane %v2964_v17, %v2996_v43 }
 0x1ab   :  { %2772 = vmatpush1.bf16.msra.mxu0 %v3410_v49  ;;  %2895 = vmatpush1.bf16.msra.mxu1 %v3412_v50  ;;  %v3015_v48 = vcombine.low %v2985_v53, %v2989_v45 }
 0x1ac   :  { %2773 = vmatprep.subr.bf16.mxu0 %v3419_v51  ;;  %2896 = vmatprep.subr.bf16.mxu1 %v3421_v52  ;;  %v3016_v49 = vcombine.low %v2993_v46, %v2997_v47 }
 0x1ad   :  { %v3023_v54 = vrot.slane %v3015_v48, %v2926_v23 }
 0x1ae   :  { %v3030_v55 = vrot.slane %v3016_v49, %v2926_v23 }
 0x1af   :  { %2774 = vmatpush1.bf16.msra.mxu0 %v3418_v58  ;;  %2897 = vmatpush1.bf16.msra.mxu1 %v3420_v60 }
 0x1b0   :  { %2775 = vmatprep.subr.bf16.mxu0 %v3427_v61  ;;  %2898 = vmatprep.subr.bf16.mxu1 %v3429_v62  ;;  %v3031_v2 = vcombine.low %v3023_v54, %v3030_v55 }
 0x1b3   :  { %2776 = vmatpush1.bf16.msra.mxu0 %v3426_v4  ;;  %2899 = vmatpush1.bf16.msra.mxu1 %v3428_v5 }
 0x1b4   :  { %2777 = vmatprep.subr.bf16.mxu0 %v3435_v6  ;;  %2900 = vmatprep.subr.bf16.mxu1 %v3437_v7 }
 0x1b7   :  { %2778 = vmatpush1.bf16.msra.mxu0 %v3434_v8  ;;  %2901 = vmatpush1.bf16.msra.mxu1 %v3436_v10 }
 0x1ba   :  { %2780 = vmatmul.mubr.bf16.vlgmr.msra.gmra.mrb[4].mxu0 %v3663_v31  ;;  %2903 = vmatmul.mubr.bf16.vlgmr.msra.gmra.mrb[4].mxu1 %v3663_v31  ;;  %v2999_v31 = vcombine.low %v2977_v21, %v2981_v22 }
 0x1bc   :  { %v3013_v28 = vrot.slane %v2999_v31, %v2926_v23 }
 0x1be   :  { %v3014_v37 = vcombine.low %v3006_v27, %v3013_v28 }
 0x1cd   :  { %v2535_v24 = vpop.f32.mrb[0].mxu0  ;;  %v2658_v25 = vpop.f32.mrb[0].mxu1 }
 0x1ce   :  { %v2537_v26 = vpop.f32.mrb[1].mxu0  ;;  %v2660_v59 = vpop.f32.mrb[1].mxu1 }
 0x1cf   :  { %v2919_v29 = vcombine.low %v2535_v24, %v2537_v26  ;;  %v2539_v30 = vpop.f32.mrb[2].mxu0  ;;  %v2920_v32 = vcombine.low %v2658_v25, %v2660_v59  ;;  %v2662_v40 = vpop.f32.mrb[2].mxu1 }
 0x1d0   :  { %v2540_v33 = vpop.f32.mrb[3].mxu0  ;;  %v2663_v63 = vpop.f32.mrb[3].mxu1 }
 0x1d1   :  { %v2927_v34 = vrot.slane %v2919_v29, %v2926_v23  ;;  %v2934_v36 = vrot.slane %v2920_v32, %v2926_v23 }
 0x1d3   :  { %v2935_v38 = vcombine.low %v2927_v34, %v2934_v36 }
 0x1d5   :  { %v3034_v39 = vadd.f32 %v3014_v37, %v2935_v38 }
 0x1d7   :  { %3036 = vst [vmem:[#allocation9] sm:$0xff] %v3034_v39 }
 0x28d   :  { %v2781_v50 = vpop.f32.mrb[4].mxu0  ;;  %v2904_v51 = vpop.f32.mrb[4].mxu1 }
 0x28e   :  { %v2783_v52 = vpop.f32.mrb[5].mxu0  ;;  %v2906_v57 = vpop.f32.mrb[5].mxu1 }
 0x28f   :  { %v2936_v56 = vcombine.low %v2781_v50, %v2783_v52  ;;  %v2785_v58 = vpop.f32.mrb[6].mxu0  ;;  %v2937_v60 = vcombine.low %v2904_v51, %v2906_v57  ;;  %v2908_v61 = vpop.f32.mrb[6].mxu1 }
 0x290   :  { %v2786_v62 = vpop.f32.mrb[7].mxu0  ;;  %v2909_v1 = vpop.f32.mrb[7].mxu1 }
 0x291   :  { %v2944_v0 = vrot.slane %v2936_v56, %v2926_v23  ;;  %v2951_v44 = vrot.slane %v2937_v60, %v2926_v23 }
 0x293   :  { %v2952_v3 = vcombine.low %v2944_v0, %v2951_v44 }
 0x295   :  { %v3035_v4 = vadd.f32 %v3031_v2, %v2952_v3 }
 0x297   :  { %3037 = vst [vmem:[#allocation9 + $0x8] sm:$0xff] %v3035_v4 }
 0x298   :  { %3556 = shalt.err (!%p3553_p0)
}
 0x299   :  { %s3557_s25 = scalar_lea.hbm %s3722_s3, 256 }
 0x29a   :  { %p3558_p1 = scmp.ne.s32.totalorder %s3722_s3, %s3557_s25  ;;  %p3561_p2 = scmp.lt.u32.totalorder %s3557_s25, %s3722_s3 }
 0x29c   :  { %p3563_p3 = pnand %p3561_p2, %p3558_p1 }
 0x29e   :  { %3566 = shalt.err (!%p3563_p3)
}
 0x29f   :  { %3047 = dma.vmem_to_hbm [thread:$0]  %s3045_s21, 256, %s3722_s3, [#allocation5]  }
 0x2a0   :  { %3571 = dma.done.wait [#allocation5], 256  }
 0x2a1   :  { %3572 = vsyncadd [#allocation5], 4294967040 }
 0x2a2   :  { %3051 = vsyncpa [#allocation4], 1 }
 0x2a3   :  { %3052 = vsyncpa [#allocation7], 1 }
 0x2a4   :  { %3053 = vsyncpa [#allocation5], 1 }

</bundles_post_ra>
